<compile_context>
chip_gen: v6e
topology: v6e:2x2x1
jax: 0.10.0
libtpu: 0.0.40
codegen_flags: <defaults>
</compile_context>

<pallas_src>
import functools

import numpy as np

import jax
import jax.numpy as jnp
from jax.experimental import pallas as pl
from jax.experimental.pallas import tpu as pltpu


# ============================================================================
# Kernel 1: fused localization network
# ============================================================================
_LOCNET_CONSTS = ("rb1", "bias1", "ra1", "rb1s", "ca1", "cb1",
                  "rb2", "bias2", "ra2", "rb2s", "ca2", "cb2",
                  "radp", "cadp", "w1p", "fcb1", "w2fc", "fcb2")


def _locnet_kernel(x_ref, rb1, bias1, ra1, rb1s, ca1, cb1,
                   rb2, bias2, ra2, rb2s, ca2, cb2,
                   radp, cadp, w1p, fcb1, w2fc, fcb2, o_ref):
    f32 = jnp.float32
    img = x_ref[0, 0]                                   # (H, W), single channel

    # ---- conv1 as banded matmuls: h1[y, co*Wo1+x] = conv + bias, ReLU -------
    kh1 = rb1.shape[0]
    ho1 = img.shape[0] - kh1 + 1
    acc1 = jnp.dot(img[0:ho1, :], rb1[0], preferred_element_type=f32)
    for i in range(1, kh1):
        acc1 = acc1 + jnp.dot(img[i:i + ho1, :], rb1[i], preferred_element_type=f32)
    h1 = jnp.maximum(acc1 + bias1[...], 0.0)            # (Ho1, C1*Wo1)

    # ---- maxpool 2x2 stride 2 via 0/1 selection matmuls + max ---------------
    hr = jnp.maximum(jnp.dot(ra1[...], h1, preferred_element_type=f32),
                     jnp.dot(rb1s[...], h1, preferred_element_type=f32))
    p1 = jnp.maximum(jnp.dot(hr, ca1[...], preferred_element_type=f32),
                     jnp.dot(hr, cb1[...], preferred_element_type=f32))  # (Hp1, C1*Wp1)

    # ---- conv2 (Cin=8) as banded matmuls ------------------------------------
    kh2 = rb2.shape[0]
    ho2 = p1.shape[0] - kh2 + 1
    acc2 = jnp.dot(p1[0:ho2, :], rb2[0], preferred_element_type=f32)
    for i in range(1, kh2):
        acc2 = acc2 + jnp.dot(p1[i:i + ho2, :], rb2[i], preferred_element_type=f32)
    h2 = jnp.maximum(acc2 + bias2[...], 0.0)            # (Ho2, C2*Wo2)

    # ---- second maxpool ------------------------------------------------------
    hr2 = jnp.maximum(jnp.dot(ra2[...], h2, preferred_element_type=f32),
                      jnp.dot(rb2s[...], h2, preferred_element_type=f32))
    p2 = jnp.maximum(jnp.dot(hr2, ca2[...], preferred_element_type=f32),
                     jnp.dot(hr2, cb2[...], preferred_element_type=f32))  # (Hp2, C2*Wp2)

    # ---- adaptive average pool to 3x3 (linear -> matmuls) -------------------
    a = jnp.dot(radp[...], p2, preferred_element_type=f32)
    a = jnp.dot(a, cadp[...], preferred_element_type=f32)                 # (3, C2*3)

    # ---- fused fc heads: concatenated layer 1, block-diagonal layer 2 -------
    h = jnp.dot(a[0:1, :], w1p[0], preferred_element_type=f32)
    for y in range(1, w1p.shape[0]):
        h = h + jnp.dot(a[y:y + 1, :], w1p[y], preferred_element_type=f32)
    h = jnp.maximum(h + fcb1[...], 0.0)                                   # (1, 64)
    out = jnp.dot(h, w2fc[...], preferred_element_type=f32) + fcb2[...]   # (1, 12)
    o_ref[0] = out        # [theta_mu | beta_pre]; softplus on beta is in wrapper


def _const_map(ndim):
    return lambda *_: (0,) * ndim


def locnet_pallas(consts, x):
    """Whole localization net in ONE pallas_call; returns raw (B, 12)."""
    B, cin, H, W = x.shape
    assert cin == 1, "PSTN's reshapes require in_channels == 1"
    ops = [consts[k] for k in _LOCNET_CONSTS]
    d2 = consts["fcb2"].shape[1]
    in_specs = [pl.BlockSpec((1, cin, H, W), lambda b: (b, 0, 0, 0))]
    in_specs += [pl.BlockSpec(a.shape, _const_map(a.ndim)) for a in ops]
    out = pl.pallas_call(
        _locnet_kernel,
        out_shape=jax.ShapeDtypeStruct((B, 1, d2), jnp.float32),
        grid=(B,),
        in_specs=in_specs,
        out_specs=pl.BlockSpec((1, 1, d2), lambda b: (b, 0, 0)),
        # tiny per-step work: keep single-core pipelining (megacore split did
        # not pay at this size per the review; flip to "parallel" if measured).
        compiler_params=pltpu.CompilerParams(dimension_semantics=("arbitrary",)),
    )(x.astype(jnp.float32), *ops)
    return out.reshape(B, d2)


# ============================================================================
# Kernel 2: fused affine-grid generation + bilinear grid_sample
# ============================================================================
def _stn_sample_kernel(ts_ref, x_ref, base_ref, o_ref):
    f32 = jnp.float32
    b = pl.program_id(0)
    s = pl.program_id(1)
    nb = pl.num_programs(0)
    r = s * nb + b                        # theta row = sample s of batch b

    C = x_ref.shape[1]
    H = x_ref.shape[2]
    W = x_ref.shape[3]
    P = base_ref.shape[1]

    xs = base_ref[0:1, :]                 # (1, P) base x-coords (nearest-downsampled)
    ys = base_ref[1:2, :]                 # (1, P) base y-coords

    t00 = ts_ref[r, 0]
    t01 = ts_ref[r, 1]
    t02 = ts_ref[r, 2]
    t10 = ts_ref[r, 3]
    t11 = ts_ref[r, 4]
    t12 = ts_ref[r, 5]

    # affine_grid (align_corners=False) evaluated directly at the selected pts
    gx = t00 * xs + t01 * ys + t02
    gy = t10 * xs + t11 * ys + t12
    # grid_sample un-normalization (align_corners=False)
    ix = (gx + 1.0) * (W * 0.5) - 0.5
    iy = (gy + 1.0) * (H * 0.5) - 0.5

    # bilinear weights with the hat function (== zeros padding for OOB)
    xi = jax.lax.broadcasted_iota(f32, (W, P), 0)
    yi = jax.lax.broadcasted_iota(f32, (H, P), 0)
    bx = jnp.maximum(1.0 - jnp.abs(xi - ix), 0.0)        # (W, P)
    ay = jnp.maximum(1.0 - jnp.abs(yi - iy), 0.0)        # (H, P)

    rows = []
    for ch in range(C):
        m = jnp.dot(x_ref[0, ch], bx, preferred_element_type=f32)   # (H, P) MXU
        rows.append(jnp.sum(ay * m, axis=0, keepdims=True))         # (1, P)
    o_ref[0, 0] = rows[0] if C == 1 else jnp.concatenate(rows, axis=0)


def _nearest_indices(out_size, in_size):
    # PyTorch F.interpolate(mode='nearest') source index: floor(i * in/out)
    idx = (np.arange(out_size) * in_size) // out_size
    return np.minimum(idx, in_size - 1)


def pallas_stn_sample(x_high_res, theta_samples, sh, sw):
    """theta_samples: (S*B, 6) rows ordered s*B + b. Returns (S, B, C, sh*sw)."""
    B, C, H, W = x_high_res.shape
    SB = theta_samples.shape[0]
    assert SB % B == 0
    S = SB // B
    P = sh * sw

    # base coords of the nearest-downsampled affine grid (static, shape-only)
    rows = _nearest_indices(sh, H)
    cols = _nearest_indices(sw, W)
    ys_b = (2.0 * rows + 1.0) / H - 1.0
    xs_b = (2.0 * cols + 1.0) / W - 1.0
    base = np.stack([np.tile(xs_b, sh), np.repeat(ys_b, sw)]).astype(np.float32)

    out = pl.pallas_call(
        _stn_sample_kernel,
        out_shape=jax.ShapeDtypeStruct((S, B, C, P), jnp.float32),
        grid=(B, S),
        in_specs=[
            pl.BlockSpec(memory_space=pltpu.MemorySpace.SMEM),   # theta (S*B, 6)
            pl.BlockSpec((1, C, H, W), lambda b, s: (b, 0, 0, 0)),
            pl.BlockSpec((2, P), lambda b, s: (0, 0)),
        ],
        out_specs=pl.BlockSpec((1, 1, C, P), lambda b, s: (s, b, 0, 0)),
        compiler_params=pltpu.CompilerParams(
            dimension_semantics=("parallel", "arbitrary")),
    )(theta_samples.astype(jnp.float32), x_high_res.astype(jnp.float32),
      jnp.asarray(base))
    return out


# ============================================================================
# One-time parameter preparation (hoisted out of the per-call forward)
# ============================================================================
def _band_matrices(w, w_in, w_out):
    """w: (Cout, Cin, kh, kw) -> (kh, Cin*w_in, Cout*w_out) banded matrices."""
    cout, cin, kh, kw = w.shape
    assert w_out == w_in - kw + 1
    out = np.zeros((kh, cin * w_in, cout * w_out), np.float32)
    xs = np.arange(w_out)
    for i in range(kh):
        for j in range(kw):
            for co in range(cout):
                for ci in range(cin):
                    out[i, ci * w_in + xs + j, co * w_out + xs] = w[co, ci, i, j]
    return out


def _pool_select_mats(h_in, w_in, ch):
    h_out, w_out = h_in // 2, w_in // 2
    ra = np.zeros((h_out, h_in), np.float32)
    rb = np.zeros((h_out, h_in), np.float32)
    ra[np.arange(h_out), 2 * np.arange(h_out)] = 1.0
    rb[np.arange(h_out), 2 * np.arange(h_out) + 1] = 1.0
    ca = np.zeros((ch * w_in, ch * w_out), np.float32)
    cb = np.zeros((ch * w_in, ch * w_out), np.float32)
    for c in range(ch):
        ca[c * w_in + 2 * np.arange(w_out), c * w_out + np.arange(w_out)] = 1.0
        cb[c * w_in + 2 * np.arange(w_out) + 1, c * w_out + np.arange(w_out)] = 1.0
    return ra, rb, ca, cb


def _adaptive_avg_mats(h_in, w_in, out, ch):
    r = np.zeros((out, h_in), np.float32)
    for i in range(out):
        s = (i * h_in) // out
        e = -(-((i + 1) * h_in) // out)
        r[i, s:e] = 1.0 / (e - s)
    cm = np.zeros((ch * w_in, ch * out), np.float32)
    for c in range(ch):
        for j in range(out):
            s = (j * w_in) // out
            e = -(-((j + 1) * w_in) // out)
            cm[c * w_in + s:c * w_in + e, c * out + j] = 1.0 / (e - s)
    return r, cm


def prepare_pstn_consts(params, small_hw):
    """Turn PSTN parameters into the matmul-friendly constants used by the
    fused loc-net kernel. Called ONCE (not inside the per-call forward)."""
    sh, sw = small_hw
    w1 = np.asarray(params["conv1_w"], np.float32)
    b1 = np.asarray(params["conv1_b"], np.float32)
    w2 = np.asarray(params["conv2_w"], np.float32)
    b2 = np.asarray(params["conv2_b"], np.float32)
    assert w1.shape[1] == 1, "PSTN's reshapes require in_channels == 1"

    c1, _, kh1, kw1 = w1.shape
    c2, _, kh2, kw2 = w2.shape
    ho1, wo1 = sh - kh1 + 1, sw - kw1 + 1
    hp1, wp1 = ho1 // 2, wo1 // 2
    ho2, wo2 = hp1 - kh2 + 1, wp1 - kw2 + 1
    hp2, wp2 = ho2 // 2, wo2 // 2

    c = {}
    c["rb1"] = _band_matrices(w1, sw, wo1)
    c["bias1"] = np.repeat(b1, wo1)[None, :]
    c["ra1"], c["rb1s"], c["ca1"], c["cb1"] = _pool_select_mats(ho1, wo1, c1)
    c["rb2"] = _band_matrices(w2, wp1, wo2)
    c["bias2"] = np.repeat(b2, wo2)[None, :]
    c["ra2"], c["rb2s"], c["ca2"], c["cb2"] = _pool_select_mats(ho2, wo2, c2)
    c["radp"], c["cadp"] = _adaptive_avg_mats(hp2, wp2, 3, c2)

    mu1_w = np.asarray(params["mu1_w"], np.float32)
    mu1_b = np.asarray(params["mu1_b"], np.float32)
    beta1_w = np.asarray(params["beta1_w"], np.float32)
    beta1_b = np.asarray(params["beta1_b"], np.float32)
    mu2_w = np.asarray(params["mu2_w"], np.float32)
    mu2_b = np.asarray(params["mu2_b"], np.float32)
    beta2_w = np.asarray(params["beta2_w"], np.float32)
    beta2_b = np.asarray(params["beta2_b"], np.float32)

    h1 = mu1_w.shape[0]
    td = mu2_w.shape[0]
    assert mu1_w.shape[1] == c2 * 9

    w1cat = np.concatenate([mu1_w.T, beta1_w.T], axis=1)            # (90, 64)
    # re-order the 90 features from torch's (co, y, x) flatten into the
    # kernel's (y, [co, x]) layout: one (30, 64) slab per y-row.
    w1p = np.zeros((3, c2 * 3, 2 * h1), np.float32)
    for y in range(3):
        for co in range(c2):
            for xx in range(3):
                w1p[y, co * 3 + xx, :] = w1cat[co * 9 + y * 3 + xx, :]
    c["w1p"] = w1p
    c["fcb1"] = np.concatenate([mu1_b, beta1_b])[None, :]
    w2blk = np.zeros((2 * h1, 2 * td), np.float32)                  # block-diag layer 2
    w2blk[:h1, :td] = mu2_w.T
    w2blk[h1:, td:] = beta2_w.T
    c["w2fc"] = w2blk
    c["fcb2"] = np.concatenate([mu2_b, beta2_b])[None, :]

    return {k: jnp.asarray(v, jnp.float32) for k, v in c.items()}


def init_params(key, in_channels, zero_second_fc=True):
    ks = jax.random.split(key, 8)
    p = {}
    p["conv1_w"] = 0.1 * jax.random.normal(ks[0], (8, in_channels, 7, 7), jnp.float32)
    p["conv1_b"] = 0.01 * jax.random.normal(ks[1], (8,), jnp.float32)
    p["conv2_w"] = 0.1 * jax.random.normal(ks[2], (10, 8, 5, 5), jnp.float32)
    p["conv2_b"] = 0.01 * jax.random.normal(ks[3], (10,), jnp.float32)
    p["mu1_w"] = 0.1 * jax.random.normal(ks[4], (32, 90), jnp.float32)
    p["mu1_b"] = jnp.zeros((32,), jnp.float32)
    p["beta1_w"] = 0.1 * jax.random.normal(ks[5], (32, 90), jnp.float32)
    p["beta1_b"] = jnp.zeros((32,), jnp.float32)
    if zero_second_fc:  # matches PSTN.__init__
        p["mu2_w"] = jnp.zeros((6, 32), jnp.float32)
        p["beta2_w"] = jnp.zeros((6, 32), jnp.float32)
    else:               # non-degenerate weights used only by the numerics check
        p["mu2_w"] = 0.1 * jax.random.normal(ks[6], (6, 32), jnp.float32)
        p["beta2_w"] = 0.1 * jax.random.normal(ks[7], (6, 32), jnp.float32)
    p["mu2_b"] = jnp.array([1, 0, 0, 0, 1, 0], jnp.float32)
    p["beta2_b"] = jnp.array([1, 0, 0, 0, 1, 0], jnp.float32)
    return p


# ============================================================================
# PSTN forward
# ============================================================================
def pstn_forward(consts, x, x_high_res, key, *, samples=5, alpha_p=1.0):
    if x_high_res is None:
        x_high_res = x
    B = x.shape[0]
    sh, sw = x.shape[2], x.shape[3]
    C = x_high_res.shape[1]

    theta12 = locnet_pallas(consts, x)                       # (B, 12) raw
    theta_mu = theta12[:, :6]
    beta = jax.nn.softplus(theta12[:, 6:])                   # stable softplus (log1p)

    # StudentT(df=2*alpha, loc=mu, scale=sqrt(beta/alpha)).rsample([S])
    # TODO(synk): jax.random.t — same distribution, different RNG stream than torch.
    t = jax.random.t(key, 2.0 * alpha_p, shape=(samples, B, 6), dtype=jnp.float32)
    theta_samples = theta_mu[None] + jnp.sqrt(beta / alpha_p)[None] * t
    theta_samples = theta_samples.reshape(samples * B, 6)    # row s*B + b

    out = pallas_stn_sample(x_high_res, theta_samples, sh, sw)   # (S, B, C, sh*sw)
    x_out = out.reshape(samples * B, C, sh, sw)
    return x_out, theta_samples, theta_mu, beta


# ============================================================================
# Pure-JAX references (used only for the numerics check in __main__)
# ============================================================================
def _maxpool2_ref(x):
    B, C, H, W = x.shape
    ho, wo = H // 2, W // 2
    x = x[:, :, :ho * 2, :wo * 2].reshape(B, C, ho, 2, wo, 2)
    return x.max(axis=(3, 5))


def _adaptive_avg_pool_ref(x, out=3):
    B, C, H, W = x.shape
    rows = []
    for i in range(out):
        rs, re = (i * H) // out, -(-((i + 1) * H) // out)
        cols_ = []
        for j in range(out):
            cs, ce = (j * W) // out, -(-((j + 1) * W) // out)
            cols_.append(x[:, :, rs:re, cs:ce].mean(axis=(2, 3)))
        rows.append(jnp.stack(cols_, axis=-1))
    return jnp.stack(rows, axis=-2)


def locnet_ref(params, x):
    dn = ("NCHW", "OIHW", "NCHW")
    hi = jax.lax.Precision.HIGHEST
    h = jax.lax.conv_general_dilated(x, params["conv1_w"], (1, 1), "VALID",
                                     dimension_numbers=dn, precision=hi)
    h = h + params["conv1_b"][None, :, None, None]
    h = jnp.maximum(_maxpool2_ref(h), 0.0)
    h = jax.lax.conv_general_dilated(h, params["conv2_w"], (1, 1), "VALID",
                                     dimension_numbers=dn, precision=hi)
    h = h + params["conv2_b"][None, :, None, None]
    h = jnp.maximum(_maxpool2_ref(h), 0.0)
    h = _adaptive_avg_pool_ref(h, 3)
    feat = h.reshape(x.shape[0], -1)
    mu = jnp.maximum(feat @ params["mu1_w"].T + params["mu1_b"], 0.0)
    mu = mu @ params["mu2_w"].T + params["mu2_b"]
    be = jnp.maximum(feat @ params["beta1_w"].T + params["beta1_b"], 0.0)
    be = be @ params["beta2_w"].T + params["beta2_b"]
    return mu, be                       # beta pre-softplus


def stn_sample_ref(x_hr, theta_flat, sh, sw):
    SB = theta_flat.shape[0]
    B, C, H, W = x_hr.shape
    theta = theta_flat.reshape(SB, 2, 3)
    xs = (2.0 * jnp.arange(W, dtype=jnp.float32) + 1.0) / W - 1.0
    ys = (2.0 * jnp.arange(H, dtype=jnp.float32) + 1.0) / H - 1.0
    X, Y = jnp.meshgrid(xs, ys)
    base = jnp.stack([X, Y, jnp.ones_like(X)], axis=-1)          # (H, W, 3)
    grid = jnp.einsum("hwk,nik->nhwi", base, theta)              # (SB, H, W, 2)
    ri = _nearest_indices(sh, H)
    ci = _nearest_indices(sw, W)
    g = grid[:, ri][:, :, ci]
    ix = (g[..., 0] + 1.0) * W / 2.0 - 0.5
    iy = (g[..., 1] + 1.0) * H / 2.0 - 0.5
    x0 = jnp.floor(ix)
    y0 = jnp.floor(iy)
    imgs = x_hr[jnp.arange(SB) % B]                              # (SB, C, H, W)

    def bilinear(img, ixn, iyn, x0n, y0n):
        out = jnp.zeros((C, sh, sw), jnp.float32)
        for dx in (0.0, 1.0):
            for dy in (0.0, 1.0):
                xc = x0n + dx
                yc = y0n + dy
                w = (1.0 - jnp.abs(ixn - xc)) * (1.0 - jnp.abs(iyn - yc))
                valid = (xc >= 0) & (xc <= W - 1) & (yc >= 0) & (yc <= H - 1)
                xg = jnp.clip(xc.astype(jnp.int32), 0, W - 1)
                yg = jnp.clip(yc.astype(jnp.int32), 0, H - 1)
                v = img[:, yg, xg]
                out = out + jnp.where(valid[None], w[None] * v, 0.0)
        return out

    return jax.vmap(bilinear)(imgs, ix, iy, x0, y0)              # (SB, C, sh, sw)


# ============================================================================
if __name__ == "__main__":
    key = jax.random.PRNGKey(0)
    k_x, k_hr, k_p, k_chk, k_t, k_s = jax.random.split(key, 6)

    in_channels = 1
    B = 2
    samples = 5
    x = jax.random.normal(k_x, (B, in_channels, 28, 28), dtype=jnp.float32)
    x_high_res = jax.random.normal(k_hr, (B, in_channels, 32, 32), dtype=jnp.float32)

    # --- numerics check 1: fused loc-net kernel vs pure-JAX reference -------
    # (use non-zero second-layer FC weights so the conv path is exercised)
    chk_params = init_params(k_chk, in_channels, zero_second_fc=False)
    chk_consts = prepare_pstn_consts(chk_params, (28, 28))
    got12 = np.asarray(locnet_pallas(chk_consts, x))
    mu_ref, beta_ref = locnet_ref(chk_params, x)
    ref12 = np.concatenate([np.asarray(mu_ref), np.asarray(beta_ref)], axis=1)
    np.testing.assert_allclose(got12, ref12, rtol=2e-2, atol=2e-2)

    # --- numerics check 2: fused grid-gen + grid_sample kernel --------------
    s_chk = 3
    theta_id = jnp.tile(jnp.asarray([1., 0., 0., 0., 1., 0.], jnp.float32),
                        (s_chk * B, 1))
    theta_chk = theta_id + 0.25 * jax.random.normal(k_t, (s_chk * B, 6), jnp.float32)
    out_p = np.asarray(pallas_stn_sample(x_high_res, theta_chk, 28, 28))
    out_p = out_p.reshape(s_chk * B, in_channels, 28, 28)
    out_r = np.asarray(stn_sample_ref(x_high_res, theta_chk, 28, 28))
    np.testing.assert_allclose(out_p, out_r, rtol=2e-2, atol=2e-2)

    # --- full forward with the module's torch-style init --------------------
    params = init_params(k_p, in_channels)            # zeroed 2nd-layer FC, identity bias
    consts = prepare_pstn_consts(params, (28, 28))    # one-time weight prep (hoisted)

    fwd = jax.jit(functools.partial(pstn_forward, samples=samples, alpha_p=1.0))
    x_out, theta_samples, theta_mu, beta = fwd(consts, x, x_high_res, k_s)
    jax.block_until_ready((x_out, theta_samples, theta_mu, beta))

    assert x_out.shape == (samples * B, in_channels, 28, 28)
    assert theta_samples.shape == (samples * B, 6)
    assert theta_mu.shape == (B, 6) and beta.shape == (B, 6)
    assert bool(jnp.all(jnp.isfinite(x_out)))
    assert bool(jnp.all(jnp.isfinite(theta_samples)))
    print("KERNEL_OK")
</pallas_src>

<mosaic_0001>
module attributes {stable_mosaic.version = 11 : i64} {
  func.func @_locnet_kernel(%arg0: i32, %arg1: memref<1x1x28x28xf32, #tpu.memory_space<vmem>>, %arg2: memref<7x28x176xf32, #tpu.memory_space<vmem>>, %arg3: memref<1x176xf32, #tpu.memory_space<vmem>>, %arg4: memref<11x22xf32, #tpu.memory_space<vmem>>, %arg5: memref<11x22xf32, #tpu.memory_space<vmem>>, %arg6: memref<176x88xf32, #tpu.memory_space<vmem>>, %arg7: memref<176x88xf32, #tpu.memory_space<vmem>>, %arg8: memref<5x88x70xf32, #tpu.memory_space<vmem>>, %arg9: memref<1x70xf32, #tpu.memory_space<vmem>>, %arg10: memref<3x7xf32, #tpu.memory_space<vmem>>, %arg11: memref<3x7xf32, #tpu.memory_space<vmem>>, %arg12: memref<70x30xf32, #tpu.memory_space<vmem>>, %arg13: memref<70x30xf32, #tpu.memory_space<vmem>>, %arg14: memref<3x3xf32, #tpu.memory_space<vmem>>, %arg15: memref<30x30xf32, #tpu.memory_space<vmem>>, %arg16: memref<3x30x64xf32, #tpu.memory_space<vmem>>, %arg17: memref<1x64xf32, #tpu.memory_space<vmem>>, %arg18: memref<64x12xf32, #tpu.memory_space<vmem>>, %arg19: memref<1x12xf32, #tpu.memory_space<vmem>>, %arg20: memref<1x1x12xf32, #tpu.memory_space<vmem>>) attributes {dimension_semantics = [#tpu.dimension_semantics<arbitrary>], iteration_bounds = array<i64: 2>, scalar_prefetch = 0 : i64, scratch_operands = 0 : i64, tpu.core_type = #tpu.core_type<tc>, window_params = [{transform_indices = @transform_0, window_bounds = array<i64: 1, 1, 28, 28>}, {pipeline_mode = #tpu.pipeline_mode<synchronous>, transform_indices = @transform_1, window_bounds = array<i64: 7, 28, 176>}, {pipeline_mode = #tpu.pipeline_mode<synchronous>, transform_indices = @transform_2, window_bounds = array<i64: 1, 176>}, {pipeline_mode = #tpu.pipeline_mode<synchronous>, transform_indices = @transform_3, window_bounds = array<i64: 11, 22>}, {pipeline_mode = #tpu.pipeline_mode<synchronous>, transform_indices = @transform_4, window_bounds = array<i64: 11, 22>}, {pipeline_mode = #tpu.pipeline_mode<synchronous>, transform_indices = @transform_5, window_bounds = array<i64: 176, 88>}, {pipeline_mode = #tpu.pipeline_mode<synchronous>, transform_indices = @transform_6, window_bounds = array<i64: 176, 88>}, {pipeline_mode = #tpu.pipeline_mode<synchronous>, transform_indices = @transform_7, window_bounds = array<i64: 5, 88, 70>}, {pipeline_mode = #tpu.pipeline_mode<synchronous>, transform_indices = @transform_8, window_bounds = array<i64: 1, 70>}, {pipeline_mode = #tpu.pipeline_mode<synchronous>, transform_indices = @transform_9, window_bounds = array<i64: 3, 7>}, {pipeline_mode = #tpu.pipeline_mode<synchronous>, transform_indices = @transform_10, window_bounds = array<i64: 3, 7>}, {pipeline_mode = #tpu.pipeline_mode<synchronous>, transform_indices = @transform_11, window_bounds = array<i64: 70, 30>}, {pipeline_mode = #tpu.pipeline_mode<synchronous>, transform_indices = @transform_12, window_bounds = array<i64: 70, 30>}, {pipeline_mode = #tpu.pipeline_mode<synchronous>, transform_indices = @transform_13, window_bounds = array<i64: 3, 3>}, {pipeline_mode = #tpu.pipeline_mode<synchronous>, transform_indices = @transform_14, window_bounds = array<i64: 30, 30>}, {pipeline_mode = #tpu.pipeline_mode<synchronous>, transform_indices = @transform_15, window_bounds = array<i64: 3, 30, 64>}, {pipeline_mode = #tpu.pipeline_mode<synchronous>, transform_indices = @transform_16, window_bounds = array<i64: 1, 64>}, {pipeline_mode = #tpu.pipeline_mode<synchronous>, transform_indices = @transform_17, window_bounds = array<i64: 64, 12>}, {pipeline_mode = #tpu.pipeline_mode<synchronous>, transform_indices = @transform_18, window_bounds = array<i64: 1, 12>}, {transform_indices = @transform_19, window_bounds = array<i64: 1, 1, 12>}]} {
    %c0 = arith.constant 0 : index
    %c0_0 = arith.constant 0 : index
    %c0_1 = arith.constant 0 : index
    %c0_2 = arith.constant 0 : index
    %0 = vector.load %arg1[%c0, %c0_0, %c0_1, %c0_2] : memref<1x1x28x28xf32, #tpu.memory_space<vmem>>, vector<1x1x28x28xf32>
    %1 = vector.shape_cast %0 : vector<1x1x28x28xf32> to vector<28x28xf32>
    %2 = vector.extract_strided_slice %1 {offsets = [0, 0], sizes = [22, 28], strides = [1, 1]} : vector<28x28xf32> to vector<22x28xf32>
    %c0_3 = arith.constant 0 : index
    %c0_4 = arith.constant 0 : index
    %c0_5 = arith.constant 0 : index
    %3 = vector.load %arg2[%c0_3, %c0_4, %c0_5] : memref<7x28x176xf32, #tpu.memory_space<vmem>>, vector<1x28x176xf32>
    %4 = vector.shape_cast %3 : vector<1x28x176xf32> to vector<28x176xf32>
    %cst = arith.constant dense<0.000000e+00> : vector<22x176xf32>
    %5 = tpu.matmul %2, %4, %cst {dimension_numbers = #tpu.dot_dimension_numbers<[1], [0], [0], [1], [0, 0, 1, 1], [], []>} : vector<22x28xf32>, vector<28x176xf32>, vector<22x176xf32> -> vector<22x176xf32>
    %6 = vector.extract_strided_slice %1 {offsets = [1, 0], sizes = [22, 28], strides = [1, 1]} : vector<28x28xf32> to vector<22x28xf32>
    %c1 = arith.constant 1 : index
    %c0_6 = arith.constant 0 : index
    %c0_7 = arith.constant 0 : index
    %7 = vector.load %arg2[%c1, %c0_6, %c0_7] : memref<7x28x176xf32, #tpu.memory_space<vmem>>, vector<1x28x176xf32>
    %8 = vector.shape_cast %7 : vector<1x28x176xf32> to vector<28x176xf32>
    %cst_8 = arith.constant dense<0.000000e+00> : vector<22x176xf32>
    %9 = tpu.matmul %6, %8, %cst_8 {dimension_numbers = #tpu.dot_dimension_numbers<[1], [0], [0], [1], [0, 0, 1, 1], [], []>} : vector<22x28xf32>, vector<28x176xf32>, vector<22x176xf32> -> vector<22x176xf32>
    %10 = arith.addf %5, %9 : vector<22x176xf32>
    %11 = vector.extract_strided_slice %1 {offsets = [2, 0], sizes = [22, 28], strides = [1, 1]} : vector<28x28xf32> to vector<22x28xf32>
    %c2 = arith.constant 2 : index
    %c0_9 = arith.constant 0 : index
    %c0_10 = arith.constant 0 : index
    %12 = vector.load %arg2[%c2, %c0_9, %c0_10] : memref<7x28x176xf32, #tpu.memory_space<vmem>>, vector<1x28x176xf32>
    %13 = vector.shape_cast %12 : vector<1x28x176xf32> to vector<28x176xf32>
    %cst_11 = arith.constant dense<0.000000e+00> : vector<22x176xf32>
    %14 = tpu.matmul %11, %13, %cst_11 {dimension_numbers = #tpu.dot_dimension_numbers<[1], [0], [0], [1], [0, 0, 1, 1], [], []>} : vector<22x28xf32>, vector<28x176xf32>, vector<22x176xf32> -> vector<22x176xf32>
    %15 = arith.addf %10, %14 : vector<22x176xf32>
    %16 = vector.extract_strided_slice %1 {offsets = [3, 0], sizes = [22, 28], strides = [1, 1]} : vector<28x28xf32> to vector<22x28xf32>
    %c3 = arith.constant 3 : index
    %c0_12 = arith.constant 0 : index
    %c0_13 = arith.constant 0 : index
    %17 = vector.load %arg2[%c3, %c0_12, %c0_13] : memref<7x28x176xf32, #tpu.memory_space<vmem>>, vector<1x28x176xf32>
    %18 = vector.shape_cast %17 : vector<1x28x176xf32> to vector<28x176xf32>
    %cst_14 = arith.constant dense<0.000000e+00> : vector<22x176xf32>
    %19 = tpu.matmul %16, %18, %cst_14 {dimension_numbers = #tpu.dot_dimension_numbers<[1], [0], [0], [1], [0, 0, 1, 1], [], []>} : vector<22x28xf32>, vector<28x176xf32>, vector<22x176xf32> -> vector<22x176xf32>
    %20 = arith.addf %15, %19 : vector<22x176xf32>
    %21 = vector.extract_strided_slice %1 {offsets = [4, 0], sizes = [22, 28], strides = [1, 1]} : vector<28x28xf32> to vector<22x28xf32>
    %c4 = arith.constant 4 : index
    %c0_15 = arith.constant 0 : index
    %c0_16 = arith.constant 0 : index
    %22 = vector.load %arg2[%c4, %c0_15, %c0_16] : memref<7x28x176xf32, #tpu.memory_space<vmem>>, vector<1x28x176xf32>
    %23 = vector.shape_cast %22 : vector<1x28x176xf32> to vector<28x176xf32>
    %cst_17 = arith.constant dense<0.000000e+00> : vector<22x176xf32>
    %24 = tpu.matmul %21, %23, %cst_17 {dimension_numbers = #tpu.dot_dimension_numbers<[1], [0], [0], [1], [0, 0, 1, 1], [], []>} : vector<22x28xf32>, vector<28x176xf32>, vector<22x176xf32> -> vector<22x176xf32>
    %25 = arith.addf %20, %24 : vector<22x176xf32>
    %26 = vector.extract_strided_slice %1 {offsets = [5, 0], sizes = [22, 28], strides = [1, 1]} : vector<28x28xf32> to vector<22x28xf32>
    %c5 = arith.constant 5 : index
    %c0_18 = arith.constant 0 : index
    %c0_19 = arith.constant 0 : index
    %27 = vector.load %arg2[%c5, %c0_18, %c0_19] : memref<7x28x176xf32, #tpu.memory_space<vmem>>, vector<1x28x176xf32>
    %28 = vector.shape_cast %27 : vector<1x28x176xf32> to vector<28x176xf32>
    %cst_20 = arith.constant dense<0.000000e+00> : vector<22x176xf32>
    %29 = tpu.matmul %26, %28, %cst_20 {dimension_numbers = #tpu.dot_dimension_numbers<[1], [0], [0], [1], [0, 0, 1, 1], [], []>} : vector<22x28xf32>, vector<28x176xf32>, vector<22x176xf32> -> vector<22x176xf32>
    %30 = arith.addf %25, %29 : vector<22x176xf32>
    %31 = vector.extract_strided_slice %1 {offsets = [6, 0], sizes = [22, 28], strides = [1, 1]} : vector<28x28xf32> to vector<22x28xf32>
    %c6 = arith.constant 6 : index
    %c0_21 = arith.constant 0 : index
    %c0_22 = arith.constant 0 : index
    %32 = vector.load %arg2[%c6, %c0_21, %c0_22] : memref<7x28x176xf32, #tpu.memory_space<vmem>>, vector<1x28x176xf32>
    %33 = vector.shape_cast %32 : vector<1x28x176xf32> to vector<28x176xf32>
    %cst_23 = arith.constant dense<0.000000e+00> : vector<22x176xf32>
    %34 = tpu.matmul %31, %33, %cst_23 {dimension_numbers = #tpu.dot_dimension_numbers<[1], [0], [0], [1], [0, 0, 1, 1], [], []>} : vector<22x28xf32>, vector<28x176xf32>, vector<22x176xf32> -> vector<22x176xf32>
    %35 = arith.addf %30, %34 : vector<22x176xf32>
    %c0_24 = arith.constant 0 : index
    %c0_25 = arith.constant 0 : index
    %36 = vector.load %arg3[%c0_24, %c0_25] : memref<1x176xf32, #tpu.memory_space<vmem>>, vector<1x176xf32>
    %37 = vector.broadcast %36 : vector<1x176xf32> to vector<22x176xf32>
    %38 = arith.addf %35, %37 : vector<22x176xf32>
    %cst_26 = arith.constant 0.000000e+00 : f32
    %39 = vector.broadcast %cst_26 : f32 to vector<22x176xf32>
    %40 = arith.maximumf %38, %39 : vector<22x176xf32>
    %c0_27 = arith.constant 0 : index
    %c0_28 = arith.constant 0 : index
    %41 = vector.load %arg4[%c0_27, %c0_28] : memref<11x22xf32, #tpu.memory_space<vmem>>, vector<11x22xf32>
    %cst_29 = arith.constant dense<0.000000e+00> : vector<11x176xf32>
    %42 = tpu.matmul %41, %40, %cst_29 {dimension_numbers = #tpu.dot_dimension_numbers<[1], [0], [0], [1], [0, 0, 1, 1], [], []>} : vector<11x22xf32>, vector<22x176xf32>, vector<11x176xf32> -> vector<11x176xf32>
    %c0_30 = arith.constant 0 : index
    %c0_31 = arith.constant 0 : index
    %43 = vector.load %arg5[%c0_30, %c0_31] : memref<11x22xf32, #tpu.memory_space<vmem>>, vector<11x22xf32>
    %cst_32 = arith.constant dense<0.000000e+00> : vector<11x176xf32>
    %44 = tpu.matmul %43, %40, %cst_32 {dimension_numbers = #tpu.dot_dimension_numbers<[1], [0], [0], [1], [0, 0, 1, 1], [], []>} : vector<11x22xf32>, vector<22x176xf32>, vector<11x176xf32> -> vector<11x176xf32>
    %45 = arith.maximumf %42, %44 : vector<11x176xf32>
    %c0_33 = arith.constant 0 : index
    %c0_34 = arith.constant 0 : index
    %46 = vector.load %arg6[%c0_33, %c0_34] : memref<176x88xf32, #tpu.memory_space<vmem>>, vector<176x88xf32>
    %cst_35 = arith.constant dense<0.000000e+00> : vector<11x88xf32>
    %47 = tpu.matmul %45, %46, %cst_35 {dimension_numbers = #tpu.dot_dimension_numbers<[1], [0], [0], [1], [0, 0, 1, 1], [], []>} : vector<11x176xf32>, vector<176x88xf32>, vector<11x88xf32> -> vector<11x88xf32>
    %c0_36 = arith.constant 0 : index
    %c0_37 = arith.constant 0 : index
    %48 = vector.load %arg7[%c0_36, %c0_37] : memref<176x88xf32, #tpu.memory_space<vmem>>, vector<176x88xf32>
    %cst_38 = arith.constant dense<0.000000e+00> : vector<11x88xf32>
    %49 = tpu.matmul %45, %48, %cst_38 {dimension_numbers = #tpu.dot_dimension_numbers<[1], [0], [0], [1], [0, 0, 1, 1], [], []>} : vector<11x176xf32>, vector<176x88xf32>, vector<11x88xf32> -> vector<11x88xf32>
    %50 = arith.maximumf %47, %49 : vector<11x88xf32>
    %51 = vector.extract_strided_slice %50 {offsets = [0, 0], sizes = [7, 88], strides = [1, 1]} : vector<11x88xf32> to vector<7x88xf32>
    %c0_39 = arith.constant 0 : index
    %c0_40 = arith.constant 0 : index
    %c0_41 = arith.constant 0 : index
    %52 = vector.load %arg8[%c0_39, %c0_40, %c0_41] : memref<5x88x70xf32, #tpu.memory_space<vmem>>, vector<1x88x70xf32>
    %53 = vector.shape_cast %52 : vector<1x88x70xf32> to vector<88x70xf32>
    %cst_42 = arith.constant dense<0.000000e+00> : vector<7x70xf32>
    %54 = tpu.matmul %51, %53, %cst_42 {dimension_numbers = #tpu.dot_dimension_numbers<[1], [0], [0], [1], [0, 0, 1, 1], [], []>} : vector<7x88xf32>, vector<88x70xf32>, vector<7x70xf32> -> vector<7x70xf32>
    %55 = vector.extract_strided_slice %50 {offsets = [1, 0], sizes = [7, 88], strides = [1, 1]} : vector<11x88xf32> to vector<7x88xf32>
    %c1_43 = arith.constant 1 : index
    %c0_44 = arith.constant 0 : index
    %c0_45 = arith.constant 0 : index
    %56 = vector.load %arg8[%c1_43, %c0_44, %c0_45] : memref<5x88x70xf32, #tpu.memory_space<vmem>>, vector<1x88x70xf32>
    %57 = vector.shape_cast %56 : vector<1x88x70xf32> to vector<88x70xf32>
    %cst_46 = arith.constant dense<0.000000e+00> : vector<7x70xf32>
    %58 = tpu.matmul %55, %57, %cst_46 {dimension_numbers = #tpu.dot_dimension_numbers<[1], [0], [0], [1], [0, 0, 1, 1], [], []>} : vector<7x88xf32>, vector<88x70xf32>, vector<7x70xf32> -> vector<7x70xf32>
    %59 = arith.addf %54, %58 : vector<7x70xf32>
    %60 = vector.extract_strided_slice %50 {offsets = [2, 0], sizes = [7, 88], strides = [1, 1]} : vector<11x88xf32> to vector<7x88xf32>
    %c2_47 = arith.constant 2 : index
    %c0_48 = arith.constant 0 : index
    %c0_49 = arith.constant 0 : index
    %61 = vector.load %arg8[%c2_47, %c0_48, %c0_49] : memref<5x88x70xf32, #tpu.memory_space<vmem>>, vector<1x88x70xf32>
    %62 = vector.shape_cast %61 : vector<1x88x70xf32> to vector<88x70xf32>
    %cst_50 = arith.constant dense<0.000000e+00> : vector<7x70xf32>
    %63 = tpu.matmul %60, %62, %cst_50 {dimension_numbers = #tpu.dot_dimension_numbers<[1], [0], [0], [1], [0, 0, 1, 1], [], []>} : vector<7x88xf32>, vector<88x70xf32>, vector<7x70xf32> -> vector<7x70xf32>
    %64 = arith.addf %59, %63 : vector<7x70xf32>
    %65 = vector.extract_strided_slice %50 {offsets = [3, 0], sizes = [7, 88], strides = [1, 1]} : vector<11x88xf32> to vector<7x88xf32>
    %c3_51 = arith.constant 3 : index
    %c0_52 = arith.constant 0 : index
    %c0_53 = arith.constant 0 : index
    %66 = vector.load %arg8[%c3_51, %c0_52, %c0_53] : memref<5x88x70xf32, #tpu.memory_space<vmem>>, vector<1x88x70xf32>
    %67 = vector.shape_cast %66 : vector<1x88x70xf32> to vector<88x70xf32>
    %cst_54 = arith.constant dense<0.000000e+00> : vector<7x70xf32>
    %68 = tpu.matmul %65, %67, %cst_54 {dimension_numbers = #tpu.dot_dimension_numbers<[1], [0], [0], [1], [0, 0, 1, 1], [], []>} : vector<7x88xf32>, vector<88x70xf32>, vector<7x70xf32> -> vector<7x70xf32>
    %69 = arith.addf %64, %68 : vector<7x70xf32>
    %70 = vector.extract_strided_slice %50 {offsets = [4, 0], sizes = [7, 88], strides = [1, 1]} : vector<11x88xf32> to vector<7x88xf32>
    %c4_55 = arith.constant 4 : index
    %c0_56 = arith.constant 0 : index
    %c0_57 = arith.constant 0 : index
    %71 = vector.load %arg8[%c4_55, %c0_56, %c0_57] : memref<5x88x70xf32, #tpu.memory_space<vmem>>, vector<1x88x70xf32>
    %72 = vector.shape_cast %71 : vector<1x88x70xf32> to vector<88x70xf32>
    %cst_58 = arith.constant dense<0.000000e+00> : vector<7x70xf32>
    %73 = tpu.matmul %70, %72, %cst_58 {dimension_numbers = #tpu.dot_dimension_numbers<[1], [0], [0], [1], [0, 0, 1, 1], [], []>} : vector<7x88xf32>, vector<88x70xf32>, vector<7x70xf32> -> vector<7x70xf32>
    %74 = arith.addf %69, %73 : vector<7x70xf32>
    %c0_59 = arith.constant 0 : index
    %c0_60 = arith.constant 0 : index
    %75 = vector.load %arg9[%c0_59, %c0_60] : memref<1x70xf32, #tpu.memory_space<vmem>>, vector<1x70xf32>
    %76 = vector.broadcast %75 : vector<1x70xf32> to vector<7x70xf32>
    %77 = arith.addf %74, %76 : vector<7x70xf32>
    %cst_61 = arith.constant 0.000000e+00 : f32
    %78 = vector.broadcast %cst_61 : f32 to vector<7x70xf32>
    %79 = arith.maximumf %77, %78 : vector<7x70xf32>
    %c0_62 = arith.constant 0 : index
    %c0_63 = arith.constant 0 : index
    %80 = vector.load %arg10[%c0_62, %c0_63] : memref<3x7xf32, #tpu.memory_space<vmem>>, vector<3x7xf32>
    %cst_64 = arith.constant dense<0.000000e+00> : vector<3x70xf32>
    %81 = tpu.matmul %80, %79, %cst_64 {dimension_numbers = #tpu.dot_dimension_numbers<[1], [0], [0], [1], [0, 0, 1, 1], [], []>} : vector<3x7xf32>, vector<7x70xf32>, vector<3x70xf32> -> vector<3x70xf32>
    %c0_65 = arith.constant 0 : index
    %c0_66 = arith.constant 0 : index
    %82 = vector.load %arg11[%c0_65, %c0_66] : memref<3x7xf32, #tpu.memory_space<vmem>>, vector<3x7xf32>
    %cst_67 = arith.constant dense<0.000000e+00> : vector<3x70xf32>
    %83 = tpu.matmul %82, %79, %cst_67 {dimension_numbers = #tpu.dot_dimension_numbers<[1], [0], [0], [1], [0, 0, 1, 1], [], []>} : vector<3x7xf32>, vector<7x70xf32>, vector<3x70xf32> -> vector<3x70xf32>
    %84 = arith.maximumf %81, %83 : vector<3x70xf32>
    %c0_68 = arith.constant 0 : index
    %c0_69 = arith.constant 0 : index
    %85 = vector.load %arg12[%c0_68, %c0_69] : memref<70x30xf32, #tpu.memory_space<vmem>>, vector<70x30xf32>
    %cst_70 = arith.constant dense<0.000000e+00> : vector<3x30xf32>
    %86 = tpu.matmul %84, %85, %cst_70 {dimension_numbers = #tpu.dot_dimension_numbers<[1], [0], [0], [1], [0, 0, 1, 1], [], []>} : vector<3x70xf32>, vector<70x30xf32>, vector<3x30xf32> -> vector<3x30xf32>
    %c0_71 = arith.constant 0 : index
    %c0_72 = arith.constant 0 : index
    %87 = vector.load %arg13[%c0_71, %c0_72] : memref<70x30xf32, #tpu.memory_space<vmem>>, vector<70x30xf32>
    %cst_73 = arith.constant dense<0.000000e+00> : vector<3x30xf32>
    %88 = tpu.matmul %84, %87, %cst_73 {dimension_numbers = #tpu.dot_dimension_numbers<[1], [0], [0], [1], [0, 0, 1, 1], [], []>} : vector<3x70xf32>, vector<70x30xf32>, vector<3x30xf32> -> vector<3x30xf32>
    %89 = arith.maximumf %86, %88 : vector<3x30xf32>
    %c0_74 = arith.constant 0 : index
    %c0_75 = arith.constant 0 : index
    %90 = vector.load %arg14[%c0_74, %c0_75] : memref<3x3xf32, #tpu.memory_space<vmem>>, vector<3x3xf32>
    %cst_76 = arith.constant dense<0.000000e+00> : vector<3x30xf32>
    %91 = tpu.matmul %90, %89, %cst_76 {dimension_numbers = #tpu.dot_dimension_numbers<[1], [0], [0], [1], [0, 0, 1, 1], [], []>} : vector<3x3xf32>, vector<3x30xf32>, vector<3x30xf32> -> vector<3x30xf32>
    %c0_77 = arith.constant 0 : index
    %c0_78 = arith.constant 0 : index
    %92 = vector.load %arg15[%c0_77, %c0_78] : memref<30x30xf32, #tpu.memory_space<vmem>>, vector<30x30xf32>
    %cst_79 = arith.constant dense<0.000000e+00> : vector<3x30xf32>
    %93 = tpu.matmul %91, %92, %cst_79 {dimension_numbers = #tpu.dot_dimension_numbers<[1], [0], [0], [1], [0, 0, 1, 1], [], []>} : vector<3x30xf32>, vector<30x30xf32>, vector<3x30xf32> -> vector<3x30xf32>
    %94 = vector.extract_strided_slice %93 {offsets = [0, 0], sizes = [1, 30], strides = [1, 1]} : vector<3x30xf32> to vector<1x30xf32>
    %c0_80 = arith.constant 0 : index
    %c0_81 = arith.constant 0 : index
    %c0_82 = arith.constant 0 : index
    %95 = vector.load %arg16[%c0_80, %c0_81, %c0_82] : memref<3x30x64xf32, #tpu.memory_space<vmem>>, vector<1x30x64xf32>
    %96 = vector.shape_cast %95 : vector<1x30x64xf32> to vector<30x64xf32>
    %cst_83 = arith.constant dense<0.000000e+00> : vector<1x64xf32>
    %97 = tpu.matmul %94, %96, %cst_83 {dimension_numbers = #tpu.dot_dimension_numbers<[1], [0], [0], [1], [0, 0, 1, 1], [], []>} : vector<1x30xf32>, vector<30x64xf32>, vector<1x64xf32> -> vector<1x64xf32>
    %98 = vector.extract_strided_slice %93 {offsets = [1, 0], sizes = [1, 30], strides = [1, 1]} : vector<3x30xf32> to vector<1x30xf32>
    %c1_84 = arith.constant 1 : index
    %c0_85 = arith.constant 0 : index
    %c0_86 = arith.constant 0 : index
    %99 = vector.load %arg16[%c1_84, %c0_85, %c0_86] : memref<3x30x64xf32, #tpu.memory_space<vmem>>, vector<1x30x64xf32>
    %100 = vector.shape_cast %99 : vector<1x30x64xf32> to vector<30x64xf32>
    %cst_87 = arith.constant dense<0.000000e+00> : vector<1x64xf32>
    %101 = tpu.matmul %98, %100, %cst_87 {dimension_numbers = #tpu.dot_dimension_numbers<[1], [0], [0], [1], [0, 0, 1, 1], [], []>} : vector<1x30xf32>, vector<30x64xf32>, vector<1x64xf32> -> vector<1x64xf32>
    %102 = arith.addf %97, %101 : vector<1x64xf32>
    %103 = vector.extract_strided_slice %93 {offsets = [2, 0], sizes = [1, 30], strides = [1, 1]} : vector<3x30xf32> to vector<1x30xf32>
    %c2_88 = arith.constant 2 : index
    %c0_89 = arith.constant 0 : index
    %c0_90 = arith.constant 0 : index
    %104 = vector.load %arg16[%c2_88, %c0_89, %c0_90] : memref<3x30x64xf32, #tpu.memory_space<vmem>>, vector<1x30x64xf32>
    %105 = vector.shape_cast %104 : vector<1x30x64xf32> to vector<30x64xf32>
    %cst_91 = arith.constant dense<0.000000e+00> : vector<1x64xf32>
    %106 = tpu.matmul %103, %105, %cst_91 {dimension_numbers = #tpu.dot_dimension_numbers<[1], [0], [0], [1], [0, 0, 1, 1], [], []>} : vector<1x30xf32>, vector<30x64xf32>, vector<1x64xf32> -> vector<1x64xf32>
    %107 = arith.addf %102, %106 : vector<1x64xf32>
    %c0_92 = arith.constant 0 : index
    %c0_93 = arith.constant 0 : index
    %108 = vector.load %arg17[%c0_92, %c0_93] : memref<1x64xf32, #tpu.memory_space<vmem>>, vector<1x64xf32>
    %109 = arith.addf %107, %108 : vector<1x64xf32>
    %cst_94 = arith.constant 0.000000e+00 : f32
    %110 = vector.broadcast %cst_94 : f32 to vector<1x64xf32>
    %111 = arith.maximumf %109, %110 : vector<1x64xf32>
    %c0_95 = arith.constant 0 : index
    %c0_96 = arith.constant 0 : index
    %112 = vector.load %arg18[%c0_95, %c0_96] : memref<64x12xf32, #tpu.memory_space<vmem>>, vector<64x12xf32>
    %cst_97 = arith.constant dense<0.000000e+00> : vector<1x12xf32>
    %113 = tpu.matmul %111, %112, %cst_97 {dimension_numbers = #tpu.dot_dimension_numbers<[1], [0], [0], [1], [0, 0, 1, 1], [], []>} : vector<1x64xf32>, vector<64x12xf32>, vector<1x12xf32> -> vector<1x12xf32>
    %c0_98 = arith.constant 0 : index
    %c0_99 = arith.constant 0 : index
    %114 = vector.load %arg19[%c0_98, %c0_99] : memref<1x12xf32, #tpu.memory_space<vmem>>, vector<1x12xf32>
    %115 = arith.addf %113, %114 : vector<1x12xf32>
    %c0_100 = arith.constant 0 : index
    %c0_101 = arith.constant 0 : index
    %c0_102 = arith.constant 0 : index
    %116 = vector.load %arg20[%c0_100, %c0_101, %c0_102] : memref<1x1x12xf32, #tpu.memory_space<vmem>>, vector<1x1x12xf32>
    %117 = vector.shape_cast %116 : vector<1x1x12xf32> to vector<1x12xf32>
    %118 = vector.shape_cast %115 : vector<1x12xf32> to vector<1x1x12xf32>
    tpu.vector_store %arg20[%c0_100, %c0_101, %c0_102], %118 {strides = array<i32>} : memref<1x1x12xf32, #tpu.memory_space<vmem>>, vector<1x1x12xf32>,
    return
  }
  func.func @transform_0(%arg0: i32) -> (i32, i32, i32, i32) {
    %c0_i32 = arith.constant 0 : i32
    %c0_i32_0 = arith.constant 0 : i32
    %c0_i32_1 = arith.constant 0 : i32
    %c0_i32_2 = arith.constant 0 : i32
    return %arg0, %c0_i32, %c0_i32_0, %c0_i32_1 : i32, i32, i32, i32
  }
  func.func @transform_1(%arg0: i32) -> (i32, i32, i32) {
    %c0_i32 = arith.constant 0 : i32
    %c0_i32_0 = arith.constant 0 : i32
    %c0_i32_1 = arith.constant 0 : i32
    %c0_i32_2 = arith.constant 0 : i32
    return %c0_i32, %c0_i32_0, %c0_i32_1 : i32, i32, i32
  }
  func.func @transform_2(%arg0: i32) -> (i32, i32) {
    %c0_i32 = arith.constant 0 : i32
    %c0_i32_0 = arith.constant 0 : i32
    %c0_i32_1 = arith.constant 0 : i32
    return %c0_i32, %c0_i32_0 : i32, i32
  }
  func.func @transform_3(%arg0: i32) -> (i32, i32) {
    %c0_i32 = arith.constant 0 : i32
    %c0_i32_0 = arith.constant 0 : i32
    %c0_i32_1 = arith.constant 0 : i32
    return %c0_i32, %c0_i32_0 : i32, i32
  }
  func.func @transform_4(%arg0: i32) -> (i32, i32) {
    %c0_i32 = arith.constant 0 : i32
    %c0_i32_0 = arith.constant 0 : i32
    %c0_i32_1 = arith.constant 0 : i32
    return %c0_i32, %c0_i32_0 : i32, i32
  }
  func.func @transform_5(%arg0: i32) -> (i32, i32) {
    %c0_i32 = arith.constant 0 : i32
    %c0_i32_0 = arith.constant 0 : i32
    %c0_i32_1 = arith.constant 0 : i32
    return %c0_i32, %c0_i32_0 : i32, i32
  }
  func.func @transform_6(%arg0: i32) -> (i32, i32) {
    %c0_i32 = arith.constant 0 : i32
    %c0_i32_0 = arith.constant 0 : i32
    %c0_i32_1 = arith.constant 0 : i32
    return %c0_i32, %c0_i32_0 : i32, i32
  }
  func.func @transform_7(%arg0: i32) -> (i32, i32, i32) {
    %c0_i32 = arith.constant 0 : i32
    %c0_i32_0 = arith.constant 0 : i32
    %c0_i32_1 = arith.constant 0 : i32
    %c0_i32_2 = arith.constant 0 : i32
    return %c0_i32, %c0_i32_0, %c0_i32_1 : i32, i32, i32
  }
  func.func @transform_8(%arg0: i32) -> (i32, i32) {
    %c0_i32 = arith.constant 0 : i32
    %c0_i32_0 = arith.constant 0 : i32
    %c0_i32_1 = arith.constant 0 : i32
    return %c0_i32, %c0_i32_0 : i32, i32
  }
  func.func @transform_9(%arg0: i32) -> (i32, i32) {
    %c0_i32 = arith.constant 0 : i32
    %c0_i32_0 = arith.constant 0 : i32
    %c0_i32_1 = arith.constant 0 : i32
    return %c0_i32, %c0_i32_0 : i32, i32
  }
  func.func @transform_10(%arg0: i32) -> (i32, i32) {
    %c0_i32 = arith.constant 0 : i32
    %c0_i32_0 = arith.constant 0 : i32
    %c0_i32_1 = arith.constant 0 : i32
    return %c0_i32, %c0_i32_0 : i32, i32
  }
  func.func @transform_11(%arg0: i32) -> (i32, i32) {
    %c0_i32 = arith.constant 0 : i32
    %c0_i32_0 = arith.constant 0 : i32
    %c0_i32_1 = arith.constant 0 : i32
    return %c0_i32, %c0_i32_0 : i32, i32
  }
  func.func @transform_12(%arg0: i32) -> (i32, i32) {
    %c0_i32 = arith.constant 0 : i32
    %c0_i32_0 = arith.constant 0 : i32
    %c0_i32_1 = arith.constant 0 : i32
    return %c0_i32, %c0_i32_0 : i32, i32
  }
  func.func @transform_13(%arg0: i32) -> (i32, i32) {
    %c0_i32 = arith.constant 0 : i32
    %c0_i32_0 = arith.constant 0 : i32
    %c0_i32_1 = arith.constant 0 : i32
    return %c0_i32, %c0_i32_0 : i32, i32
  }
  func.func @transform_14(%arg0: i32) -> (i32, i32) {
    %c0_i32 = arith.constant 0 : i32
    %c0_i32_0 = arith.constant 0 : i32
    %c0_i32_1 = arith.constant 0 : i32
    return %c0_i32, %c0_i32_0 : i32, i32
  }
  func.func @transform_15(%arg0: i32) -> (i32, i32, i32) {
    %c0_i32 = arith.constant 0 : i32
    %c0_i32_0 = arith.constant 0 : i32
    %c0_i32_1 = arith.constant 0 : i32
    %c0_i32_2 = arith.constant 0 : i32
    return %c0_i32, %c0_i32_0, %c0_i32_1 : i32, i32, i32
  }
  func.func @transform_16(%arg0: i32) -> (i32, i32) {
    %c0_i32 = arith.constant 0 : i32
    %c0_i32_0 = arith.constant 0 : i32
    %c0_i32_1 = arith.constant 0 : i32
    return %c0_i32, %c0_i32_0 : i32, i32
  }
  func.func @transform_17(%arg0: i32) -> (i32, i32) {
    %c0_i32 = arith.constant 0 : i32
    %c0_i32_0 = arith.constant 0 : i32
    %c0_i32_1 = arith.constant 0 : i32
    return %c0_i32, %c0_i32_0 : i32, i32
  }
  func.func @transform_18(%arg0: i32) -> (i32, i32) {
    %c0_i32 = arith.constant 0 : i32
    %c0_i32_0 = arith.constant 0 : i32
    %c0_i32_1 = arith.constant 0 : i32
    return %c0_i32, %c0_i32_0 : i32, i32
  }
  func.func @transform_19(%arg0: i32) -> (i32, i32, i32) {
    %c0_i32 = arith.constant 0 : i32
    %c0_i32_0 = arith.constant 0 : i32
    %c0_i32_1 = arith.constant 0 : i32
    return %arg0, %c0_i32, %c0_i32_0 : i32, i32, i32
  }
}

</mosaic_0001>

<bundles_post_ra>
// kernel: tpu_custom_call.1
= control target key start
LH: loop header
LB: loop body
LE: loop exit
PB: predicated region body
PF: predicated region fallthrough
CT: control target
= control target key end

     0   :  { %s5495_s0 = inlined_call_operand.vmem [shape: f32[2,1,28,28], index: 0, kind: input, shape index: {}]   ;;  %s5496_s1 = inlined_call_operand.vmem [shape: f32[7,28,176], index: 1, kind: input, shape index: {}]   ;;  %s5497_s2 = inlined_call_operand.vmem [shape: f32[1,176], index: 2, kind: input, shape index: {}]   ;;  %s5498_s3 = inlined_call_operand.hbm [shape: f32[11,22], index: 3, kind: input, shape index: {}]   ;;  %s5499_s4 = inlined_call_operand.hbm [shape: f32[11,22], index: 4, kind: input, shape index: {}]   ;;  %s5500_s5 = inlined_call_operand.vmem [shape: f32[176,88], index: 5, kind: input, shape index: {}]   ;;  %s5501_s6 = inlined_call_operand.vmem [shape: f32[176,88], index: 6, kind: input, shape index: {}]   ;;  %s5502_s7 = inlined_call_operand.vmem [shape: f32[5,88,70], index: 7, kind: input, shape index: {}]   ;;  %s5503_s8 = inlined_call_operand.hbm [shape: f32[1,70], index: 8, kind: input, shape index: {}]   ;;  %s5504_s9 = inlined_call_operand.hbm [shape: f32[3,7], index: 9, kind: input, shape index: {}]   ;;  %s5505_s10 = inlined_call_operand.hbm [shape: f32[3,7], index: 10, kind: input, shape index: {}]   ;;  %s5506_s11 = inlined_call_operand.vmem [shape: f32[70,30], index: 11, kind: input, shape index: {}]   ;;  %s5507_s12 = inlined_call_operand.vmem [shape: f32[70,30], index: 12, kind: input, shape index: {}]   ;;  %s5508_s13 = inlined_call_operand.hbm [shape: f32[3,3], index: 13, kind: input, shape index: {}]   ;;  %s5509_s14 = inlined_call_operand.hbm [shape: f32[30,30], index: 14, kind: input, shape index: {}]   ;;  %s5510_s15 = inlined_call_operand.hbm [shape: f32[3,30,64], index: 15, kind: input, shape index: {}]   ;;  %s5511_s16 = inlined_call_operand.vmem [shape: f32[1,64], index: 16, kind: input, shape index: {}]   ;;  %s5512_s17 = inlined_call_operand.vmem [shape: f32[64,12], index: 17, kind: input, shape index: {}]   ;;  %s5513_s18 = inlined_call_operand.vmem [shape: f32[1,12], index: 18, kind: input, shape index: {}]   ;;  %s5514_s19 = inlined_call_operand.hbm [shape: f32[2,1,12], index: 19, kind: output, shape index: {}]  }
   0x1   :  { %5530 = sst [smem:[#allocation29_spill]] %s5495_s0 }
   0x2   :  { %5531 = sst [smem:[#allocation30_spill]] %s5496_s1 }
   0x3   :  { %5532 = sst [smem:[#allocation31_spill]] %s5497_s2 }
   0x4   :  { %5533 = sst [smem:[#allocation32_spill]] %s5498_s3 }
   0x5   :  { %5534 = sst [smem:[#allocation33_spill]] %s5499_s4 }
   0x6   :  { %5535 = sst [smem:[#allocation34_spill]] %s5514_s19 }
   0x7   :  { %24 = vsyncpa [#allocation3], 0 }
   0x8   :  { %25 = vsyncpa [#allocation6], 0 }
   0x9   :  { %26 = vsyncpa [#allocation9], 0 }
   0xa   :  { %27 = vsyncpa [#allocation12], 0 }
   0xb   :  { %28 = vsyncpa [#allocation15], 0 }
   0xc   :  { %29 = vsyncpa [#allocation4], 0 }
   0xd   :  { %31 = vsyncpa [#allocation4 + $0x1], 0  ;;  %s4407_s0 = smov 0   ;;  %s4409_s30 = smov 0  }
   0xe   :  { %s4411_s20 = smov 0   ;;  %s4413_s21 = smov 0  }
   0xf LB: > { %5536 = sst [smem:[#allocation23_spill]] %s4280_s0  ;;  %s4428_s1 = sadd.s32 4294967295, %s4292_s21   ;;  %s4292_s21 = sphi %s4413_s21, %s5571_s21   ;;  %s4288_s20 = sphi %s4411_s20, %s5573_s20   ;;  %s4284_s30 = sphi %s4409_s30, %s5575_s30   ;;  %s4280_s0 = sphi %s4407_s0, %s5574_s0  }
  0x10   : > { %5537 = sst [smem:[#allocation24_spill]] %s4288_s20  ;;  %s3330_s22 = sadd.s32 4294967294, %s4292_s21  }
  0x11   : > { %5538 = sst [smem:[#allocation25_spill]] %s4292_s21  ;;  %s4432_s2 = sadd.s32 1, %s4292_s21  }
  0x12   : > { %5539 = sst [smem:[#allocation26_spill]] %s4432_s2  ;;  %s448_s23 = sadd.s32 1, %s4288_s20 }
  0x13   : > { %s445_s24 = ssub.s32 %s4292_s21, %s4432_s2  ;;  %p458_p0 = scmp.ne.s32.totalorder %s4288_s20, %s4284_s30 }
  0x14   : > { %p446_p1 = scmp.eq.s32.totalorder %s445_s24, 0  ;;  %p459_p2 = scmp.eq.s32.totalorder %s4428_s1, 1 }
  0x15   : > { %p464_p3 = scmp.ne.s32.totalorder %s4284_s30, %s4280_s0  ;;  %p465_p4 = scmp.eq.s32.totalorder %s3330_s22, 1 }
  0x16   : > { %s4443_s25 = scalar_select %p446_p1, %s4288_s20, %s448_s23  }
  0x17   : > { %p4445_p5 = por %p459_p2, %p458_p0  ;;  %p4449_p6 = por %p465_p4, %p464_p3 }
  0x18   : > { %5540 = sst [smem:[#allocation27_spill]] %s4443_s25  ;;  %p3331_p7 = scmp.ge.s32.totalorder %s4292_s21, 1 }
  0x19   : > { %s5541_s3 = scalar_select %p4445_p5, 1, 0 }
  0x1a   : > { %s5542_s26 = scalar_select %p4449_p6, 1, 0 }
  0x1b   : > { %p472_p8 = scmp.lt.s32.totalorder %s4292_s21, 3  ;;  %p5523_p9 = scmp.eq.s32.totalorder %s4428_s1, 0 }
  0x1c   : > { %5543 = sst [smem:[#allocation28_spill]] %s5542_s26  ;;  %s4294_s28 = smov [#allocation5]  }
  0x1d   : > { %p4456_p10 = pnand %p3331_p7, %p472_p8  ;;  %s503_s29 = sshll.u32 %s4294_s28, 4  ;;  %s504_s29 = int_to_ptr.vmem [resolvable:$true] %s503_s29 }
  0x1e   : > { %s4295_s23 = smov [#allocation8]   ;;  %s4296_s25 = smov [#allocation11]  }
  0x1f   : > { %s5544_s27 = scalar_select %p4456_p10, 1, 0 }
  0x20   : > { %p3914_p11 = pneg %p4456_p10  ;;  %s537_s24 = sshll.u32 %s4295_s23, 4  ;;  %s538_s24 = int_to_ptr.vmem [resolvable:$true] %s537_s24 }
  0x21   : > { %s565_s20 = sshll.u32 %s4296_s25, 4  ;;  %s4015_s26 = scalar_lea.vmem %s504_s29, 256  ;;  %s566_s20 = int_to_ptr.vmem [resolvable:$true] %s565_s20 }
  0x22   : > { %p4464_p12 = pnand %p5523_p9, %p3914_p11  ;;  %p4016_p0 = scmp.ne.s32.totalorder %s504_s29, %s4015_s26 }
  0x23   : > { %p4023_p3 = scmp.lt.s32.totalorder %s504_s29, %s504_s29  ;;  %p4024_p4 = scmp.lt.s32.totalorder %s4015_s26, %s4015_s26 }
  0x24   : > { %p4470_p13 = pneg %p4464_p12 }
  0x25   : > { %p4025_p7 = por %p4024_p4, %p4023_p3 }
  0x26   : > { %p4018_p1 = pnand %p4016_p0, %p4470_p13 }
  0x28   : > { %p4019_p2 = pneg %p4018_p1 }
  0x2a   : > { %p4026_p8 = pnand %p4025_p7, %p4019_p2 }
  0x2c   : > { %4029 = shalt.err (!%p4026_p8)
}
  0x2d   : > { %s5526_s28 = smov 128   ;;  %s5528_s25 = smov 8  }
  0x2e   : > { %s5547_s4 = sld [smem:[#allocation33_spill]]  ;;  %s4041_s21 = scalar_lea.vmem %s538_s24, 64 }
  0x2f   : > { %p4042_p11 = scmp.ne.s32.totalorder %s538_s24, %s4041_s21  ;;  %p4049_p3 = scmp.lt.s32.totalorder %s538_s24, %s538_s24 }
  0x30   : > { %p4050_p2 = scmp.lt.s32.totalorder %s4041_s21, %s4041_s21 }
  0x31   : > { %p4044_p0 = pnand %p4042_p11, %p4470_p13 }
  0x32   : > { %p4051_p4 = por %p4050_p2, %p4049_p3 }
  0x33   : > { %p4045_p1 = pneg %p4044_p0 }
  0x34   : > { %3920 = dma.hbm_to_vmem [thread:$0]  (!%p4464_p12), %s5547_s4, 256, %s504_s29, [#allocation6], %s5526_s28, %s5526_s28, %s5528_s25  }
  0x35   : > { %p4052_p7 = pnand %p4051_p4, %p4045_p1 }
  0x37   : > { %4055 = shalt.err (!%p4052_p7)
}
  0x38   : > { %3926 = dma.hbm_to_vmem [thread:$0]  (!%p4464_p12), %s5504_s9, 64, %s538_s24, [#allocation9]  }
  0x39   : > { %s4067_s0 = scalar_lea.vmem %s566_s20, 64  ;;  %p4075_p11 = scmp.lt.s32.totalorder %s566_s20, %s566_s20 }
  0x3a   : > { %p4068_p8 = scmp.ne.s32.totalorder %s566_s20, %s4067_s0  ;;  %p4076_p0 = scmp.lt.s32.totalorder %s4067_s0, %s4067_s0 }
  0x3c   : > { %p4070_p9 = pnand %p4068_p8, %p4470_p13  ;;  %p4077_p5 = por %p4076_p0, %p4075_p11 }
  0x3e   : > { %p4071_p6 = pneg %p4070_p9 }
  0x40   : > { %p4078_p10 = pnand %p4077_p5, %p4071_p6 }
  0x42   : > { %4081 = shalt.err (!%p4078_p10)
}
  0x43   : > { %3932 = dma.hbm_to_vmem [thread:$0]  (!%p4464_p12), %s5508_s13, 64, %s566_s20, [#allocation12]  }
  0x44   : > { %s4299_s19 = smov [#allocation2]   ;;  %s4300_s23 = smov [#allocation7]  }
  0x45   : > { %s490_s24 = sshll.u32 %s4299_s19, 4  ;;  %s526_s26 = sshll.u32 %s4300_s23, 4  ;;  %s491_s24 = int_to_ptr.vmem [resolvable:$true] %s490_s24  ;;  %s527_s26 = int_to_ptr.vmem [resolvable:$true] %s526_s26 }
  0x46   : > { %s4093_s28 = scalar_lea.vmem %s491_s24, 256  ;;  %p4101_p2 = scmp.lt.s32.totalorder %s491_s24, %s491_s24 }
  0x47   : > { %p4094_p1 = scmp.ne.s32.totalorder %s491_s24, %s4093_s28  ;;  %p4102_p5 = scmp.lt.s32.totalorder %s4093_s28, %s4093_s28 }
  0x49   : > { %p4096_p9 = pnand %p4094_p1, %p4470_p13  ;;  %p4103_p6 = por %p4102_p5, %p4101_p2 }
  0x4b   : > { %p4097_p3 = pneg %p4096_p9 }
  0x4d   : > { %p4104_p10 = pnand %p4103_p6, %p4097_p3 }
  0x4f   : > { %4107 = shalt.err (!%p4104_p10)
}
  0x50   : > { %s5548_s0 = smov 128   ;;  %s5549_s29 = sld [smem:[#allocation32_spill]] }
  0x51   : > { %s4119_s19 = scalar_lea.vmem %s527_s26, 16  ;;  %s4126_s28 = scalar_lea.vmem %s527_s26, 32 }
  0x52   : > { %p4120_p4 = scmp.ne.s32.totalorder %s527_s26, %s4119_s19  ;;  %p4127_p11 = scmp.lt.s32.totalorder %s527_s26, %s527_s26 }
  0x53   : > { %p4128_p0 = scmp.lt.s32.totalorder %s4126_s28, %s4119_s19 }
  0x54   : > { %p4122_p7 = pnand %p4120_p4, %p4470_p13 }
  0x55   : > { %p4129_p1 = por %p4128_p0, %p4127_p11 }
  0x56   : > { %3917 = dma.hbm_to_vmem [thread:$0]  (!%p4464_p12), %s5549_s29, 256, %s491_s24, [#allocation3], %s5548_s0, %s5548_s0, %s5528_s25  }
  0x57   : > { %p4123_p8 = pneg %p4122_p7 }
  0x59   : > { %p4130_p9 = pnand %p4129_p1, %p4123_p8 }
  0x5b   : > { %4133 = shalt.err (!%p4130_p9)
}
  0x5c   : > { %3923 = dma.hbm_to_vmem [thread:$0]  (!%p4464_p12), %s5503_s8, 16, %s527_s26, [#allocation6]  }
  0x5d   : > { %s4301_s24 = smov [#allocation10]   ;;  %s4302_s21 = smov [#allocation13]  }
  0x5e   : > { %s548_s20 = sshll.u32 %s4301_s24, 4  ;;  %s575_s29 = sshll.u32 %s4302_s21, 4  ;;  %s549_s20 = int_to_ptr.vmem [resolvable:$true] %s548_s20  ;;  %s576_s29 = int_to_ptr.vmem [resolvable:$true] %s575_s29 }
  0x5f   : > { %s4145_s25 = scalar_lea.vmem %s549_s20, 64  ;;  %p4153_p6 = scmp.lt.s32.totalorder %s549_s20, %s549_s20 }
  0x60   : > { %p4146_p3 = scmp.ne.s32.totalorder %s549_s20, %s4145_s25  ;;  %p4154_p10 = scmp.lt.s32.totalorder %s4145_s25, %s4145_s25 }
  0x62   : > { %p4148_p2 = pnand %p4146_p3, %p4470_p13  ;;  %p4155_p4 = por %p4154_p10, %p4153_p6 }
  0x64   : > { %p4149_p5 = pneg %p4148_p2 }
  0x66   : > { %p4156_p7 = pnand %p4155_p4, %p4149_p5 }
  0x68   : > { %4159 = shalt.err (!%p4156_p7)
}
  0x69   : > { %3929 = dma.hbm_to_vmem [thread:$0]  (!%p4464_p12), %s5505_s10, 64, %s549_s20, [#allocation9]  }
  0x6a   : > { %s4171_s26 = scalar_lea.vmem %s576_s29, 512  ;;  %p4179_p1 = scmp.lt.s32.totalorder %s576_s29, %s576_s29 }
  0x6b   : > { %p4172_p8 = scmp.ne.s32.totalorder %s576_s29, %s4171_s26  ;;  %p4180_p9 = scmp.lt.s32.totalorder %s4171_s26, %s4171_s26 }
  0x6d   : > { %p4174_p11 = pnand %p4172_p8, %p4470_p13  ;;  %p4181_p3 = por %p4180_p9, %p4179_p1 }
  0x6f   : > { %p4175_p0 = pneg %p4174_p11 }
  0x71   : > { %p4182_p2 = pnand %p4181_p3, %p4175_p0 }
  0x73   : > { %4185 = shalt.err (!%p4182_p2)
}
  0x74   : > { %s5550_s25 = smov 8   ;;  %s4303_s24 = smov [#allocation14]  }
  0x75   : > { %3935 = dma.hbm_to_vmem [thread:$0]  (!%p4464_p12), %s5509_s14, 512, %s576_s29, [#allocation12], %s5548_s0, %s5548_s0, %s5550_s25  }
  0x76   : > { %s588_s20 = sshll.u32 %s4303_s24, 4  ;;  %s589_s20 = int_to_ptr.vmem [resolvable:$true] %s588_s20 }
  0x77   : > { %s4197_s21 = scalar_lea.vmem %s589_s20, 1536  ;;  %p4205_p4 = scmp.lt.s32.totalorder %s589_s20, %s589_s20 }
  0x78   : > { %p4198_p5 = scmp.ne.s32.totalorder %s589_s20, %s4197_s21  ;;  %p4206_p7 = scmp.lt.s32.totalorder %s4197_s21, %s4197_s21 }
  0x7a   : > { %p4200_p6 = pnand %p4198_p5, %p4470_p13  ;;  %p4207_p8 = por %p4206_p7, %p4205_p4 }
  0x7c   : > { %p4201_p10 = pneg %p4200_p6 }
  0x7e   : > { %p4208_p11 = pnand %p4207_p8, %p4201_p10 }
  0x80   : > { %4211 = shalt.err (!%p4208_p11)
}
  0x81   : > { %3938 = dma.hbm_to_vmem [thread:$0]  (!%p4464_p12), %s5510_s15, 1536, %s589_s20, [#allocation15], %s5548_s0, %s5548_s0, %s5550_s25  }
  0x82   : > { %p5551_p0 = scmp.ne.s32.totalorder %s5544_s27, 0 }
  0x83   : > { %p5552_p13 = scmp.eq.s32.totalorder (!%p5551_p0), %s4428_s1, 0 }
  0x84   : > { %621 = sbr.rel (%p5551_p0) target bundleno = 2265 (0x8d9), region = 96 }
  0x89   : > { %4255 = dma.done.wait (%p5552_p13), [#allocation3], 256   ;;  %p5553_p1 = pmov %p5552_p13 }
  0x8b   : > { %4257 = vsyncadd (%p5553_p1), [#allocation3], 4294967040  ;;  %p5554_p9 = pmov %p5553_p1 }
  0x8c   : > { %p5555_p3 = pmov %p5553_p1 }
  0x8d   : > { %4259 = dma.done.wait (%p5554_p9), [#allocation6], 272  }
  0x8e   : > { %4261 = vsyncadd (%p5555_p3), [#allocation6], 4294967024  ;;  %p5556_p2 = pmov %p5553_p1 }
  0x8f   : > { %p5557_p12 = pmov %p5553_p1 }
  0x90   : > { %4263 = dma.done.wait (%p5556_p2), [#allocation9], 128  }
  0x91   : > { %4265 = vsyncadd (%p5557_p12), [#allocation9], 4294967168  ;;  %p5558_p5 = pmov %p5553_p1 }
  0x92   : > { %p5559_p6 = pmov %p5553_p1 }
  0x93   : > { %4267 = dma.done.wait (%p5558_p5), [#allocation12], 576  }
  0x94   : > { %4269 = vsyncadd (%p5559_p6), [#allocation12], 4294966720  ;;  %p5560_p10 = pmov %p5553_p1 }
  0x95   : > { %p5561_p4 = pmov %p5553_p1 }
  0x96   : > { %4271 = dma.done.wait (%p5560_p10), [#allocation15], 1536  }
  0x97   : > { %4273 = vsyncadd (%p5561_p4), [#allocation15], 4294965760  ;;  %p704_p7 = scmp.lt.s32.totalorder %s4428_s1, 1  ;;  %v4304_v0 = vmov 0.0   ;;  %vm746_vm0 = vcmask 1043456   ;;  %s5562_s19 = sld [smem:[#allocation30_spill]] }
  0x98   : > { %817 = vmatprep.mubr.f32.mxu0 %v4304_v0  ;;  %912 = vmatprep.mubr.f32.mxu1 %v4304_v0  ;;  %s5563_s21 = sld [smem:[#allocation29_spill]]  ;;  %vm733_vm1 = vcmask 1046528   ;;  %vm739_vm2 = vcmask 228352   ;;  %vm940_vm3 = vcmask 1045504   ;;  %vm1057_vm4 = vcmask 1044480   ;;  %s702_s22 = sand.u32 1, %s4284_s30  }
  0x99   : > { %s705_s2 = scalar_select %p704_p7, %s4428_s1, 1  ;;  %vm1292_vm5 = vcmask 1042432   ;;  %vm1410_vm6 = vcmask 1041408   ;;  %vm1545_vm7 = vcmask 179200   ;;  %vm1746_vm8 = vcmask 392192  }
  0x9a   : > { %s5564_s29 = sld [smem:[#allocation31_spill]]  ;;  %vm4305_vm9 = vmmov 0   ;;  %vm1952_vm10 = vcmask 719872   ;;  %vm2372_vm11 = vcmask 56320   ;;  %vm2533_vm12 = vcmask 572416   ;;  %s3516_s25 = sshll.u32 %s4428_s1, 4 }
  0x9b   : > { %s3519_s27 = sshll.u32 %s705_s2, 5  ;;  %vm2694_vm13 = vcmask 23552   ;;  %vm2775_vm14 = vcmask 244736   ;;  %vm3107_vm15 = vcmask 523264   ;;  %s5565_s24 = sld [smem:[#allocation34_spill]] }
  0x9c   : > { %p5566_p11 = scmp.ne.s32.totalorder %s5541_s3, 0  ;;  %s4306_s1 = smov [#allocation16]  }
  0x9d   : > { %v3359_v1 = vld [vmem:[%s5562_s19 + $0x78] sm:$0xf]  ;;  %v3358_v3 = vld [vmem:[%s5562_s19 + $0x70] sm:$0xf]  ;;  %v3357_v5 = vld [vmem:[%s5562_s19 + $0x68] sm:$0xff]  ;;  %s4216_s2 = sshll.u32 %s4306_s1, 4  ;;  %s4217_s2 = int_to_ptr.vmem [resolvable:$false] %s4216_s2 }
  0x9e   : > { %v720_v2 = vld [vmem:[%s5562_s19 + $0x38] sm:$0xf]  ;;  %3360 = vmatprep.subr.msk.mxu0 %vm746_vm0, %v3359_v1  ;;  %v719_v4 = vld [vmem:[%s5562_s19 + $0x30] sm:$0xf]  ;;  %v718_v6 = vld [vmem:[%s5562_s19 + $0x28] sm:$0xff]  ;;  %s4602_s4 = scalar_lea.vmem %s5563_s21, %s3519_s27  ;;  %s703_s27 = scalar_lea.vmem [#allocation16], %s702_s22 }
  0x9f   : > { %3365 = vmatprep.subr.msk.mxu1 %vm746_vm0, %v720_v2  ;;  %3361 = vmatpush1.msk.msra.mxu0 %vm746_vm0, %v3358_v3  ;;  %v3356_v7 = vld [vmem:[%s5562_s19 + $0x60] sm:$0xff]  ;;  %v3355_v9 = vld [vmem:[%s5562_s19 + $0x58] sm:$0xff]  ;;  %v3354_v11 = vld [vmem:[%s5562_s19 + $0x50] sm:$0xff]  ;;  %s3196_s28 = sshll.u32 %s703_s27, 4  ;;  %s3184_s21 = scalar_lea.sflag [#allocation4], %s702_s22  ;;  %s3197_s28 = int_to_ptr.vmem [resolvable:$true] %s3196_s28 }
  0xa0   : > { %3366 = vmatpush1.msk.msra.mxu1 %vm746_vm0, %v719_v4  ;;  %v717_v8 = vld [vmem:[%s5562_s19 + $0x20] sm:$0xff]  ;;  %779 = vmatprep.subr.mxu0 %v3357_v5  ;;  %v716_v10 = vld [vmem:[%s5562_s19 + $0x18] sm:$0xff]  ;;  %v715_v12 = vld [vmem:[%s5562_s19 + $0x10] sm:$0xff]  ;;  %s4218_s0 = scalar_lea.vmem %s4217_s2, 32  ;;  %p4219_p1 = scmp.lt.s32.totalorder %s3197_s28, %s4217_s2 }
  0xa1   : > { %874 = vmatprep.subr.mxu1 %v718_v6  ;;  %780 = vmatpush1.msra.mxu0 %v3356_v7  ;;  %v3353_v13 = vld [vmem:[%s5562_s19 + $0x48] sm:$0xff]  ;;  %v3352_v15 = vld [vmem:[%s5562_s19 + $0x40] sm:$0xff]  ;;  %v4634_v21 = vld [vmem:[%s4602_s4 + $0x10] sm:$0xff]  ;;  %s5460_s20 = scalar_lea.hbm %s5565_s24, %s3516_s25 }
  0xa2   : > { %875 = vmatpush1.msra.mxu1 %v717_v8  ;;  %v714_v14 = vld [vmem:[%s5562_s19 + $0x8] sm:$0xff]  ;;  %781 = vmatprep.subr.mxu0 %v3355_v9  ;;  %v713_v16 = vld [vmem:[%s5562_s19] sm:$0xff]  ;;  %v737_v22 = vrot.slane %v4634_v21, 1  ;;  %v3377_v24 = vld [vmem:[%s5562_s19 + $0xb8] sm:$0xf]  ;;  %v944_v44 = vrot.slane %v4634_v21, 2 }
  0xa3   : > { %876 = vmatprep.subr.mxu1 %v716_v10  ;;  %v4626_v17 = vld [vmem:[%s4602_s4] sm:$0xff]  ;;  %v4629_v18 = vld [vmem:[%s4602_s4 + $0x8] sm:$0xff]  ;;  %782 = vmatpush1.msra.mxu0 %v3354_v11  ;;  %v3390_v25 = vld [vmem:[%s5562_s19 + $0xf8] sm:$0xf]  ;;  %v1061_v49 = vrot.slane %v4634_v21, 3  ;;  %v1178_v10 = vrot.slane %v4634_v21, 4 }
  0xa4   : > { %877 = vmatpush1.msra.mxu1 %v715_v12  ;;  %v734_v19 = vrot.slane %v4626_v17, 1  ;;  %v735_v20 = vrot.slane %v4629_v18, 1  ;;  %783 = vmatprep.subr.mxu0 %v3353_v13  ;;  %v3376_v26 = vld [vmem:[%s5562_s19 + $0xb0] sm:$0xf]  ;;  %v3375_v29 = vld [vmem:[%s5562_s19 + $0xa8] sm:$0xff]  ;;  %v3374_v30 = vld [vmem:[%s5562_s19 + $0xa0] sm:$0xff] }
  0xa5   : > { %878 = vmatprep.subr.mxu1 %v714_v14  ;;  %784 = vmatpush1.msra.mxu0 %v3352_v15  ;;  %v3389_v27 = vld [vmem:[%s5562_s19 + $0xf0] sm:$0xf]  ;;  %v3373_v31 = vld [vmem:[%s5562_s19 + $0x98] sm:$0xff]  ;;  %v3388_v32 = vld [vmem:[%s5562_s19 + $0xe8] sm:$0xff]  ;;  %v941_v33 = vrot.slane %v4626_v17, 2  ;;  %v942_v34 = vrot.slane %v4629_v18, 2 }
  0xa6   : > { %879 = vmatpush1.msra.mxu1 %v713_v16  ;;  %v736_v23 = vsel %vm733_vm1, %v734_v19, %v735_v20  ;;  %v738_v28 = vsel %vm733_vm1, %v735_v20, %v737_v22  ;;  %3378 = vmatprep.subr.msk.mxu0 %vm746_vm0, %v3377_v24  ;;  %v3372_v35 = vld [vmem:[%s5562_s19 + $0x90] sm:$0xff]  ;;  %v3387_v36 = vld [vmem:[%s5562_s19 + $0xe0] sm:$0xff]  ;;  %v3371_v37 = vld [vmem:[%s5562_s19 + $0x88] sm:$0xff]  ;;  %v1058_v40 = vrot.slane %v4626_v17, 3  ;;  %v1059_v41 = vrot.slane %v4629_v18, 3 }
  0xa7   : > { %3362 = vmatmul.mubr.msk.f32.vlgmr.msra.gmra.mxu0 %vm739_vm2, %v736_v23  ;;  %3367 = vmatmul.mubr.msk.f32.vlgmr.msra.gmra.mxu1 %vm739_vm2, %v4626_v17  ;;  %v3386_v38 = vld [vmem:[%s5562_s19 + $0xd8] sm:$0xff]  ;;  %v3370_v39 = vld [vmem:[%s5562_s19 + $0x80] sm:$0xff]  ;;  %v3385_v42 = vld [vmem:[%s5562_s19 + $0xd0] sm:$0xff]  ;;  %v943_v43 = vsel %vm940_vm3, %v941_v33, %v942_v34  ;;  %v945_v50 = vsel %vm940_vm3, %v942_v34, %v944_v44  ;;  %v1175_v62 = vrot.slane %v4626_v17, 4  ;;  %v1176_v63 = vrot.slane %v4629_v18, 4 }
  0xa8   : > { %823 = vmatprep.mubr.f32.mxu0 %v4304_v0  ;;  %918 = vmatprep.mubr.f32.mxu1 %v4304_v0  ;;  %v3384_v45 = vld [vmem:[%s5562_s19 + $0xc8] sm:$0xff]  ;;  %v3383_v46 = vld [vmem:[%s5562_s19 + $0xc0] sm:$0xff]  ;;  %v1060_v47 = vsel %vm1057_vm4, %v1058_v40, %v1059_v41  ;;  %v3403_v48 = vld [vmem:[%s5562_s19 + $0x138] sm:$0xf]  ;;  %v1062_v55 = vsel %vm1057_vm4, %v1059_v41, %v1061_v49  ;;  %v1293_v6 = vrot.slane %v4626_v17, 5  ;;  %v1294_v7 = vrot.slane %v4629_v18, 5 }
  0xa9   : > { %3391 = vmatprep.subr.msk.mxu1 %vm746_vm0, %v3390_v25  ;;  %3379 = vmatpush1.msk.msra.mxu0 %vm746_vm0, %v3376_v26  ;;  %v3402_v51 = vld [vmem:[%s5562_s19 + $0x130] sm:$0xf]  ;;  %v3416_v52 = vld [vmem:[%s5562_s19 + $0x178] sm:$0xf]  ;;  %v3401_v54 = vld [vmem:[%s5562_s19 + $0x128] sm:$0xff]  ;;  %v1177_v9 = vsel %vm746_vm0, %v1175_v62, %v1176_v63  ;;  %v1296_v15 = vrot.slane %v4634_v21, 5  ;;  %v1179_v16 = vsel %vm746_vm0, %v1176_v63, %v1178_v10 }
  0xaa   : > { %3392 = vmatpush1.msk.msra.mxu1 %vm746_vm0, %v3389_v27  ;;  %984 = vmatprep.subr.mxu0 %v3375_v29  ;;  %v4727_v53 = vld [vmem:[%s4602_s4 + $0x18] sm:$0xf]  ;;  %v3400_v56 = vld [vmem:[%s5562_s19 + $0x120] sm:$0xff]  ;;  %v3415_v57 = vld [vmem:[%s5562_s19 + $0x170] sm:$0xf]  ;;  %v1295_v13 = vsel %vm1292_vm5, %v1293_v6, %v1294_v7  ;;  %v1412_v29 = vrot.slane %v4629_v18, 6 }
  0xab   : > { %3363 = vmatmul.mubr.msk.f32.gmra.mxu0 %vm739_vm2, %v738_v28  ;;  %3368 = vmatmul.mubr.msk.f32.gmra.mxu1 %vm739_vm2, %v4629_v18  ;;  %v1063_v58 = vrot.slane %v4727_v53, 3  ;;  %v3399_v59 = vld [vmem:[%s5562_s19 + $0x118] sm:$0xff]  ;;  %v3414_v60 = vld [vmem:[%s5562_s19 + $0x168] sm:$0xff]  ;;  %v3398_v61 = vld [vmem:[%s5562_s19 + $0x110] sm:$0xff]  ;;  %v1180_v19 = vrot.slane %v4727_v53, 4  ;;  %v1297_v23 = vsel %vm1292_vm5, %v1294_v7, %v1296_v15  ;;  %v1298_v25 = vrot.slane %v4727_v53, 5 }
  0xac   : > { %829 = vmatprep.mubr.f32.mxu0 %v4304_v0  ;;  %924 = vmatprep.mubr.f32.mxu1 %v4304_v0  ;;  %v3413_v1 = vld [vmem:[%s5562_s19 + $0x160] sm:$0xff]  ;;  %v3397_v2 = vld [vmem:[%s5562_s19 + $0x108] sm:$0xff]  ;;  %v3412_v4 = vld [vmem:[%s5562_s19 + $0x158] sm:$0xff]  ;;  %v1411_v28 = vrot.slane %v4626_v17, 6  ;;  %v1414_v33 = vrot.slane %v4634_v21, 6 }
  0xad   : > { %985 = vmatpush1.msra.mxu0 %v3374_v30  ;;  %1103 = vmatprep.subr.mxu1 %v3388_v32  ;;  %v1064_v3 = vsel %vm1057_vm4, %v1061_v49, %v1063_v58  ;;  %v3396_v5 = vld [vmem:[%s5562_s19 + $0x100] sm:$0xff]  ;;  %v3411_v8 = vld [vmem:[%s5562_s19 + $0x150] sm:$0xff]  ;;  %v3410_v11 = vld [vmem:[%s5562_s19 + $0x148] sm:$0xff]  ;;  %v1181_v26 = vsel %vm746_vm0, %v1178_v10, %v1180_v19  ;;  %v1299_v17 = vsel %vm1292_vm5, %v1296_v15, %v1298_v25 }
  0xae   : > { %986 = vmatprep.subr.mxu0 %v3373_v31  ;;  %1104 = vmatpush1.msra.mxu1 %v3387_v36  ;;  %v3409_v12 = vld [vmem:[%s5562_s19 + $0x140] sm:$0xff]  ;;  %v3429_v14 = vld [vmem:[%s5562_s19 + $0x1b8] sm:$0xf]  ;;  %v3428_v20 = vld [vmem:[%s5562_s19 + $0x1b0] sm:$0xf]  ;;  %v1413_v32 = vsel %vm1410_vm6, %v1411_v28, %v1412_v29  ;;  %v1415_v34 = vsel %vm1410_vm6, %v1412_v29, %v1414_v33 }
  0xaf   : > { %3364 = vmatmul.mubr.msk.f32.gmra.mxu0 %vm739_vm2, %v737_v22  ;;  %3369 = vmatmul.mubr.msk.f32.gmra.mxu1 %vm739_vm2, %v4634_v21  ;;  %v3427_v22 = vld [vmem:[%s5562_s19 + $0x1a8] sm:$0xff]  ;;  %v3426_v24 = vld [vmem:[%s5562_s19 + $0x1a0] sm:$0xff]  ;;  %v3425_v27 = vld [vmem:[%s5562_s19 + $0x198] sm:$0xff] }
  0xb0   : > { %987 = vmatpush1.msra.mxu0 %v3372_v35  ;;  %1105 = vmatprep.subr.mxu1 %v3386_v38  ;;  %v3424_v30 = vld [vmem:[%s5562_s19 + $0x190] sm:$0xff]  ;;  %v3423_v31 = vld [vmem:[%s5562_s19 + $0x188] sm:$0xff]  ;;  %v3422_v18 = vld [vmem:[%s5562_s19 + $0x180] sm:$0xff]  ;;  %v1416_v35 = vrot.slane %v4727_v53, 6 }
  0xb1   : > { %988 = vmatprep.subr.mxu0 %v3371_v37  ;;  %1022 = vmatprep.mubr.f32.mxu0 %v4304_v0  ;;  %v1739_v36 = vld [vmem:[%s5500_s5 + $0x78] sm:$0xff]  ;;  %v1738_v37 = vld [vmem:[%s5500_s5 + $0x70] sm:$0xff]  ;;  %v1737_v38 = vld [vmem:[%s5500_s5 + $0x68] sm:$0xff] }
  0xb2   : > { %989 = vmatpush1.msra.mxu0 %v3370_v39  ;;  %1106 = vmatpush1.msra.mxu1 %v3385_v42  ;;  %v1417_v21 = vsel %vm1410_vm6, %v1414_v33, %v1416_v35  ;;  %v1736_v39 = vld [vmem:[%s5500_s5 + $0x60] sm:$0xff]  ;;  %v1735_v40 = vld [vmem:[%s5500_s5 + $0x58] sm:$0xff]  ;;  %v1734_v41 = vld [vmem:[%s5500_s5 + $0x50] sm:$0xff] }
  0xb3   : > { %3380 = vmatmul.mubr.msk.f32.vlgmr.msra.gmra.mxu0 %vm739_vm2, %v943_v43  ;;  %1107 = vmatprep.subr.mxu1 %v3384_v45  ;;  %v1733_v42 = vld [vmem:[%s5500_s5 + $0x48] sm:$0xff]  ;;  %v1732_v43 = vld [vmem:[%s5500_s5 + $0x40] sm:$0xff]  ;;  %v1730_v45 = vld [vmem:[%s5500_s5 + $0x30] sm:$0xff] }
  0xb4   : > { %1141 = vmatprep.mubr.f32.mxu1 %v4304_v0  ;;  %1108 = vmatpush1.msra.mxu1 %v3383_v46  ;;  %v1729_v46 = vld [vmem:[%s5500_s5 + $0x28] sm:$0xff]  ;;  %v1726_v49 = vld [vmem:[%s5500_s5 + $0x10] sm:$0xff] }
  0xb5   : > { %1028 = vmatprep.mubr.f32.mxu0 %v4304_v0  ;;  %3393 = vmatmul.mubr.msk.f32.vlgmr.msra.gmra.mxu1 %vm739_vm2, %v1060_v47  ;;  %v1728_v47 = vld [vmem:[%s5500_s5 + $0x20] sm:$0xff] }
  0xb6   : > { %3404 = vmatprep.subr.msk.mxu0 %vm746_vm0, %v3403_v48  ;;  %1147 = vmatprep.mubr.f32.mxu1 %v4304_v0  ;;  %v1727_v48 = vld [vmem:[%s5500_s5 + $0x18] sm:$0xff] }
  0xb7   : > { %3381 = vmatmul.mubr.msk.f32.gmra.mxu0 %vm739_vm2, %v945_v50  ;;  %3417 = vmatprep.subr.msk.mxu1 %vm746_vm0, %v3416_v52  ;;  %v1725_v50 = vld [vmem:[%s5500_s5 + $0x8] sm:$0xff] }
  0xb8   : > { %3405 = vmatpush1.msk.msra.mxu0 %vm746_vm0, %v3402_v51  ;;  %1034 = vmatprep.mubr.f32.mxu0 %v4304_v0 }
  0xb9   : > { %1220 = vmatprep.subr.mxu0 %v3401_v54  ;;  %3394 = vmatmul.mubr.msk.f32.gmra.mxu1 %vm739_vm2, %v1062_v55 }
  0xba   : > { %1221 = vmatpush1.msra.mxu0 %v3400_v56  ;;  %3418 = vmatpush1.msk.msra.mxu1 %vm746_vm0, %v3415_v57 }
  0xbb   : > { %3382 = vmatmul.mubr.msk.f32.gmra.mxu0 %vm739_vm2, %v944_v44  ;;  %1222 = vmatprep.subr.mxu0 %v3399_v59  ;;  %v1731_v44 = vld [vmem:[%s5500_s5 + $0x38] sm:$0xff] }
  0xbc   : > { %1338 = vmatprep.subr.mxu1 %v3414_v60  ;;  %1153 = vmatprep.mubr.f32.mxu1 %v4304_v0 }
  0xbd   : > { %1223 = vmatpush1.msra.mxu0 %v3398_v61  ;;  %1339 = vmatpush1.msra.mxu1 %v3413_v1 }
  0xbe   : > { %1224 = vmatprep.subr.mxu0 %v3397_v2  ;;  %3395 = vmatmul.mubr.msk.f32.gmra.mxu1 %vm739_vm2, %v1064_v3 }
  0xbf   : > { %1340 = vmatprep.subr.mxu1 %v3412_v4  ;;  %1225 = vmatpush1.msra.mxu0 %v3396_v5 }
  0xc0   : > { %1258 = vmatprep.mubr.f32.mxu0 %v4304_v0  ;;  %1341 = vmatpush1.msra.mxu1 %v3411_v8 }
  0xc1   : > { %3406 = vmatmul.mubr.msk.f32.vlgmr.msra.gmra.mxu0 %vm739_vm2, %v1177_v9  ;;  %1342 = vmatprep.subr.mxu1 %v3410_v11 }
  0xc2   : > { %1376 = vmatprep.mubr.f32.mxu1 %v4304_v0  ;;  %1343 = vmatpush1.msra.mxu1 %v3409_v12 }
  0xc3   : > { %1264 = vmatprep.mubr.f32.mxu0 %v4304_v0  ;;  %3419 = vmatmul.mubr.msk.f32.vlgmr.msra.gmra.mxu1 %vm739_vm2, %v1295_v13 }
  0xc4   : > { %3430 = vmatprep.subr.msk.mxu0 %vm746_vm0, %v3429_v14  ;;  %1382 = vmatprep.mubr.f32.mxu1 %v4304_v0 }
  0xc5   : > { %3407 = vmatmul.mubr.msk.f32.gmra.mxu0 %vm739_vm2, %v1179_v16 }
  0xc6   : > { %3431 = vmatpush1.msk.msra.mxu0 %vm746_vm0, %v3428_v20  ;;  %1270 = vmatprep.mubr.f32.mxu0 %v4304_v0 }
  0xc7   : > { %1456 = vmatprep.subr.mxu0 %v3427_v22  ;;  %3420 = vmatmul.mubr.msk.f32.gmra.mxu1 %vm739_vm2, %v1297_v23 }
  0xc8   : > { %1457 = vmatpush1.msra.mxu0 %v3426_v24  ;;  %1388 = vmatprep.mubr.f32.mxu1 %v4304_v0 }
  0xc9   : > { %3408 = vmatmul.mubr.msk.f32.gmra.mxu0 %vm739_vm2, %v1181_v26  ;;  %1458 = vmatprep.subr.mxu0 %v3425_v27 }
  0xca   : > { %1459 = vmatpush1.msra.mxu0 %v3424_v30  ;;  %1494 = vmatprep.mubr.f32.mxu0 %v4304_v0 }
  0xcb   : > { %1460 = vmatprep.subr.mxu0 %v3423_v31  ;;  %3421 = vmatmul.mubr.msk.f32.gmra.mxu1 %vm739_vm2, %v1299_v17 }
  0xcc   : > { %1461 = vmatpush1.msra.mxu0 %v3422_v18  ;;  %1622 = vmatprep.mubr.f32.mxu1 %v4304_v0 }
  0xcd   : > { %3432 = vmatmul.mubr.msk.f32.vlgmr.msra.gmra.mxu0 %vm739_vm2, %v1413_v32  ;;  %1753 = vmatprep.subr.mxu0 %v4304_v0  ;;  %v1521_v32 = vlaneseq }
  0xce   : > { %1500 = vmatprep.mubr.f32.mxu0 %v4304_v0  ;;  %1754 = vmatpush1.msra.mxu0 %v1739_v36 }
  0xcf   : > { %1755 = vmatprep.subr.mxu0 %v4304_v0 }
  0xd0   : > { %1756 = vmatpush1.msra.mxu0 %v1738_v37 }
  0xd1   : > { %3433 = vmatmul.mubr.msk.f32.gmra.mxu0 %vm739_vm2, %v1415_v34  ;;  %1757 = vmatprep.subr.mxu0 %v4304_v0 }
  0xd2   : > { %1506 = vmatprep.mubr.f32.mxu0 %v4304_v0  ;;  %1758 = vmatpush1.msra.mxu0 %v1737_v38 }
  0xd3   : > { %1759 = vmatprep.subr.mxu0 %v4304_v0 }
  0xd4   : > { %1760 = vmatpush1.msra.mxu0 %v1736_v39 }
  0xd5   : > { %3434 = vmatmul.mubr.msk.f32.gmra.mxu0 %vm739_vm2, %v1417_v21  ;;  %1761 = vmatprep.subr.mxu0 %v4304_v0 }
  0xd6   : > { %1762 = vmatpush1.msra.mxu0 %v1735_v40  ;;  %v1522_v40 = vshrl.u32 %v1521_v32, 7  ;;  %v1838_v32 = vld [vmem:[%s5501_s6 + $0x50] sm:$0xff] }
  0xd7   : > { %1763 = vmatprep.subr.mxu0 %v4304_v0 }
  0xd8   : > { %1764 = vmatpush1.msra.mxu0 %v1734_v41 }
  0xd9   : > { %1765 = vmatprep.subr.mxu0 %v4304_v0 }
  0xda   : > { %1766 = vmatpush1.msra.mxu0 %v1733_v42 }
  0xdb   : > { %1767 = vmatprep.subr.mxu0 %v4304_v0 }
  0xdc   : > { %1768 = vmatpush1.msra.mxu0 %v1732_v43 }
  0xdd   : > { %1769 = vmatprep.subr.mxu0 %v4304_v0 }
  0xde   : > { %1770 = vmatpush1.msra.mxu0 %v1731_v44 }
  0xdf   : > { %1771 = vmatprep.subr.mxu0 %v4304_v0 }
  0xe0   : > { %1772 = vmatpush1.msra.mxu0 %v1730_v45 }
  0xe1   : > { %1773 = vmatprep.subr.mxu0 %v4304_v0 }
  0xe2   : > { %1774 = vmatpush1.msra.mxu0 %v1729_v46 }
  0xe3   : > { %1775 = vmatprep.subr.mxu0 %v4304_v0 }
  0xe4   : > { %1776 = vmatpush1.msra.mxu0 %v1728_v47 }
  0xe5   : > { %1777 = vmatprep.subr.mxu0 %v4304_v0 }
  0xe6   : > { %1778 = vmatpush1.msra.mxu0 %v1727_v48 }
  0xe7   : > { %1779 = vmatprep.subr.mxu0 %v4304_v0 }
  0xe8   : > { %1780 = vmatpush1.msra.mxu0 %v1726_v49 }
  0xe9   : > { %1781 = vmatprep.subr.mxu0 %v4304_v0 }
  0xea   : > { %1782 = vmatpush1.msra.mxu0 %v1725_v50 }
  0xeb   : > { %1783 = vmatprep.subr.mxu0 %v4304_v0 }
 0x167   : > { %v819_v51 = vpop.f32.mrf.mxu0  ;;  %v914_v52 = vpop.f32.mrf.mxu1 }
 0x168   : > { %v915_v30 = vadd.f32 %v914_v52, %v819_v51 }
 0x169   : > { %v821_v53 = vpop.f32.mrf.mxu0  ;;  %v916_v54 = vpop.f32.mrf.mxu1 }
 0x16a   : > { %v917_v26 = vadd.f32 %v916_v54, %v821_v53  ;;  %v1523_v53 = vsub.s32 0, %v1522_v40 }
 0x16b   : > { %v825_v55 = vpop.f32.mrf.mxu0  ;;  %v920_v56 = vpop.f32.mrf.mxu1 }
 0x16c   : > { %v921_v24 = vadd.f32 %v920_v56, %v825_v55 }
 0x16d   : > { %v827_v57 = vpop.f32.mrf.mxu0  ;;  %v922_v58 = vpop.f32.mrf.mxu1 }
 0x16e   : > { %v923_v20 = vadd.f32 %v922_v58, %v827_v57  ;;  %v1519_v57 = vld [vmem:[%s5564_s29] sm:$0x3]  ;;  %v1527_v58 = vsub.s32 1, %v1522_v40  ;;  %v1829_v40 = vld [vmem:[%s5501_s6 + $0x8] sm:$0xff]  ;;  %s4212_s29 = scalar_lea.vmem %s3197_s28, 16 }
 0x16f   : > { %v831_v59 = vpop.f32.mrf.mxu0  ;;  %v926_v60 = vpop.f32.mrf.mxu1  ;;  %p4213_p8 = scmp.ne.s32.totalorder %s3197_s28, %s4212_s29  ;;  %p4220_p9 = scmp.lt.s32.totalorder %s4218_s0, %s4212_s29 }
 0x170   : > { %v927_v22 = vadd.f32 %v926_v60, %v831_v59 }
 0x171   : > { %v833_v61 = vpop.f32.mrf.mxu0  ;;  %v928_v63 = vpop.f32.mrf.mxu1  ;;  %p4214_p0 = pnand %p4213_p8, %p5566_p11  ;;  %p4221_p3 = por %p4220_p9, %p4219_p1 }
 0x172   : > { %v929_v27 = vadd.f32 %v928_v63, %v833_v61 }
 0x173   : > { %v1024_v62 = vpop.f32.mrf.mxu0  ;;  %p4215_p13 = pneg %p4214_p0 }
 0x174   : > { %v1041_v35 = vadd.f32 %v1024_v62, %v915_v30  ;;  %v1636_v30 = vld [vmem:[#allocation5 + $0x8] sm:$0x7] }
 0x175   : > { %v1026_v1 = vpop.f32.mrf.mxu0  ;;  %v1143_v2 = vpop.f32.mrf.mxu1  ;;  %p4222_p2 = pnand %p4221_p3, %p4215_p13 }
 0x176   : > { %v1042_v33 = vadd.f32 %v1026_v1, %v917_v26  ;;  %v1160_v46 = vadd.f32 %v1143_v2, %v1041_v35  ;;  %v1544_v26 = vld [vmem:[#allocation2 + $0x8] sm:$0x7]  ;;  %v1835_v35 = vld [vmem:[%s5501_s6 + $0x38] sm:$0xff] }
 0x177   : > { %v1030_v3 = vpop.f32.mrf.mxu0  ;;  %v1145_v4 = vpop.f32.mrf.mxu1 }
 0x178   : > { %v1043_v31 = vadd.f32 %v1030_v3, %v921_v24  ;;  %v1161_v42 = vadd.f32 %v1145_v4, %v1042_v33  ;;  %v1524_v3 = vrot.slane %v1519_v57, %v1523_v53  ;;  %v1837_v33 = vld [vmem:[%s5501_s6 + $0x48] sm:$0xff]  ;;  %v1740_v53 = vld [vmem:[%s5500_s5 + $0x80] sm:$0xff] }
 0x179   : > { %v1032_v5 = vpop.f32.mrf.mxu0  ;;  %v1149_v6 = vpop.f32.mrf.mxu1 }
 0x17a   : > { %v1044_v28 = vadd.f32 %v1032_v5, %v923_v20  ;;  %v1162_v38 = vadd.f32 %v1149_v6, %v1043_v31  ;;  %v1841_v31 = vld [vmem:[%s5501_s6 + $0x68] sm:$0xff] }
 0x17b   : > { %v1036_v7 = vpop.f32.mrf.mxu0  ;;  %v1151_v8 = vpop.f32.mrf.mxu1 }
 0x17c   : > { %v1045_v29 = vadd.f32 %v1036_v7, %v927_v22  ;;  %v1163_v36 = vadd.f32 %v1151_v8, %v1044_v28  ;;  %v1528_v7 = vrot.slane %v1519_v57, %v1527_v58  ;;  %v1843_v28 = vld [vmem:[%s5501_s6 + $0x78] sm:$0xff] }
 0x17d   : > { %v1038_v9 = vpop.f32.mrf.mxu0 }
 0x17e   : > { %v1155_v10 = vpop.f32.mrf.mxu1  ;;  %v1046_v34 = vadd.f32 %v1038_v9, %v929_v27  ;;  %v1635_v27 = vld [vmem:[#allocation5] sm:$0xff] }
 0x17f   : > { %v1164_v37 = vadd.f32 %v1155_v10, %v1045_v29  ;;  %v1842_v29 = vld [vmem:[%s5501_s6 + $0x70] sm:$0xff] }
 0x180   : > { %v1157_v11 = vpop.f32.mrf.mxu1 }
 0x181   : > { %v1260_v12 = vpop.f32.mrf.mxu0  ;;  %v1165_v43 = vadd.f32 %v1157_v11, %v1046_v34  ;;  %v1836_v34 = vld [vmem:[%s5501_s6 + $0x40] sm:$0xff] }
 0x182   : > { %v1277_v51 = vadd.f32 %v1260_v12, %v1160_v46  ;;  %v1848_v46 = vld [vmem:[%s5501_s6 + $0xa0] sm:$0xff] }
 0x183   : > { %v1262_v13 = vpop.f32.mrf.mxu0  ;;  %v1378_v14 = vpop.f32.mrf.mxu1 }
 0x184   : > { %v1278_v49 = vadd.f32 %v1262_v13, %v1161_v42  ;;  %v1395_v2 = vadd.f32 %v1378_v14, %v1277_v51  ;;  %v1828_v42 = vld [vmem:[%s5501_s6] sm:$0xff]  ;;  %v1741_v51 = vld [vmem:[%s5500_s5 + $0x88] sm:$0xff] }
 0x185   : > { %v1266_v15 = vpop.f32.mrf.mxu0  ;;  %v1380_v16 = vpop.f32.mrf.mxu1 }
 0x186   : > { %v1279_v47 = vadd.f32 %v1266_v15, %v1162_v38  ;;  %v1396_v61 = vadd.f32 %v1380_v16, %v1278_v49  ;;  %v1831_v38 = vld [vmem:[%s5501_s6 + $0x18] sm:$0xff]  ;;  %v1742_v49 = vld [vmem:[%s5500_s5 + $0x90] sm:$0xff] }
 0x187   : > { %v1268_v19 = vpop.f32.mrf.mxu0  ;;  %v1384_v23 = vpop.f32.mrf.mxu1 }
 0x188   : > { %v1280_v44 = vadd.f32 %v1268_v19, %v1163_v36  ;;  %v1397_v59 = vadd.f32 %v1384_v23, %v1279_v47  ;;  %v1833_v36 = vld [vmem:[%s5501_s6 + $0x28] sm:$0xff]  ;;  %v1743_v47 = vld [vmem:[%s5500_s5 + $0x98] sm:$0xff] }
 0x189   : > { %v1272_v25 = vpop.f32.mrf.mxu0  ;;  %v1386_v17 = vpop.f32.mrf.mxu1 }
 0x18a   : > { %v1281_v45 = vadd.f32 %v1272_v25, %v1164_v37  ;;  %v1398_v55 = vadd.f32 %v1386_v17, %v1280_v44  ;;  %v1543_v25 = vld [vmem:[#allocation2] sm:$0xff]  ;;  %v1849_v44 = vld [vmem:[%s5501_s6 + $0xa8] sm:$0xff] }
 0x18b   : > { %v1274_v18 = vpop.f32.mrf.mxu0  ;;  %v1390_v39 = vpop.f32.mrf.mxu1  ;;  %v1840_v17 = vld [vmem:[%s5501_s6 + $0x60] sm:$0xff] }
 0x18c   : > { %v1282_v50 = vadd.f32 %v1274_v18, %v1165_v43  ;;  %v1399_v56 = vadd.f32 %v1390_v39, %v1281_v45  ;;  %v1839_v18 = vld [vmem:[%s5501_s6 + $0x58] sm:$0xff]  ;;  %v1832_v37 = vld [vmem:[%s5501_s6 + $0x20] sm:$0xff]  ;;  %v1830_v39 = vld [vmem:[%s5501_s6 + $0x10] sm:$0xff] }
 0x18d   : > { %v1496_v21 = vpop.f32.mrf.mxu0  ;;  %v1392_v52 = vpop.f32.mrf.mxu1  ;;  %v1745_v43 = vld [vmem:[%s5500_s5 + $0xa8] sm:$0xff]  ;;  %v1744_v45 = vld [vmem:[%s5500_s5 + $0xa0] sm:$0xff] }
 0x18e   : > { %v1400_v62 = vadd.f32 %v1392_v52, %v1282_v50  ;;  %v1513_v9 = vadd.f32 %v1496_v21, %v1395_v2  ;;  %v1834_v21 = vld [vmem:[%s5501_s6 + $0x30] sm:$0xff]  ;;  %v1845_v52 = vld [vmem:[%s5501_s6 + $0x88] sm:$0xff] }
 0x18f   : > { %v1498_v41 = vpop.f32.mrf.mxu0  ;;  %v1846_v50 = vld [vmem:[%s5501_s6 + $0x90] sm:$0xff]  ;;  %v3457_v2 = vld [vmem:[%s5502_s7 + $0xa8] sm:$0xff] }
 0x190   : > { %v1514_v6 = vadd.f32 %v1498_v41, %v1396_v61  ;;  %v1531_v20 = vadd.f32 %v1524_v3, %v1513_v9  ;;  %v1724_v41 = vld [vmem:[%s5500_s5] sm:$0xff]  ;;  %v3455_v9 = vld [vmem:[%s5502_s7 + $0x98] sm:$0xff] }
 0x191   : > { %v1502_v48 = vpop.f32.mrf.mxu0  ;;  %1784 = vmatpush1.msra.mxu0 %v1724_v41  ;;  %v3468_v41 = vld [vmem:[%s5502_s7 + $0xf0] sm:$0xff] }
 0x192   : > { %v1515_v4 = vadd.f32 %v1502_v48, %v1397_v59  ;;  %v1532_v15 = vadd.f32 %v1528_v7, %v1514_v6  ;;  %v1537_v24 = vmax.f32 %v1531_v20, 0.0  ;;  %1805 = vmatprep.subr.mxu0 %v4304_v0  ;;  %v1847_v48 = vld [vmem:[%s5501_s6 + $0x98] sm:$0xff]  ;;  %v1936_v6 = vld [vmem:[%s5502_s7 + $0x48] sm:$0xff]  ;;  %v1931_v20 = vld [vmem:[%s5502_s7 + $0x20] sm:$0xff] }
 0x193   : > { %v1504_v54 = vpop.f32.mrf.mxu0  ;;  %1806 = vmatpush2.msra.mxu0 %v1745_v43  ;;  %v3467_v43 = vld [vmem:[%s5502_s7 + $0xe8] sm:$0xff] }
 0x194   : > { %v1516_v63 = vadd.f32 %v1504_v54, %v1398_v55  ;;  %v1533_v13 = vadd.f32 %v1524_v3, %v1515_v4  ;;  %v1538_v14 = vmax.f32 %v1532_v15, 0.0  ;;  %1807 = vmatprep.subr.mxu0 %v4304_v0  ;;  %v1844_v54 = vld [vmem:[%s5501_s6 + $0x80] sm:$0xff]  ;;  %v1932_v15 = vld [vmem:[%s5502_s7 + $0x28] sm:$0xff] }
 0x195   : > { %v1508_v60 = vpop.f32.mrf.mxu0  ;;  %1808 = vmatpush2.msra.mxu0 %v1744_v45  ;;  %v3466_v45 = vld [vmem:[%s5502_s7 + $0xe0] sm:$0xff] }
 0x196   : > { %v1517_v1 = vadd.f32 %v1508_v60, %v1399_v56  ;;  %v1534_v11 = vadd.f32 %v1528_v7, %v1516_v63  ;;  %v1539_v23 = vmax.f32 %v1533_v13, 0.0  ;;  %1809 = vmatprep.subr.mxu0 %v4304_v0  ;;  %v3453_v13 = vld [vmem:[%s5502_s7 + $0x88] sm:$0xff] }
 0x197   : > { %v1510_v5 = vpop.f32.mrf.mxu0  ;;  %1810 = vmatpush2.msra.mxu0 %v1743_v47  ;;  %v3465_v47 = vld [vmem:[%s5502_s7 + $0xd8] sm:$0xff] }
 0x198   : > { %v1518_v8 = vadd.f32 %v1510_v5, %v1400_v62  ;;  %v1535_v10 = vadd.f32 %v1524_v3, %v1517_v1  ;;  %v1540_v16 = vmax.f32 %v1534_v11, 0.0  ;;  %1811 = vmatprep.subr.mxu0 %v4304_v0  ;;  %v1937_v1 = vld [vmem:[%s5502_s7 + $0x50] sm:$0xff] }
 0x199   : > { %1812 = vmatpush2.msra.mxu0 %v1742_v49  ;;  %v3454_v11 = vld [vmem:[%s5502_s7 + $0x90] sm:$0xff] }
 0x19a   : > { %v1536_v12 = vadd.f32 %v1528_v7, %v1518_v8  ;;  %v1541_v22 = vmax.f32 %v1535_v10, 0.0  ;;  %1813 = vmatprep.subr.mxu0 %v4304_v0  ;;  %v3456_v7 = vld [vmem:[%s5502_s7 + $0xa0] sm:$0xff]  ;;  %v1934_v10 = vld [vmem:[%s5502_s7 + $0x38] sm:$0xff]  ;;  %v3464_v49 = vld [vmem:[%s5502_s7 + $0xd0] sm:$0xff] }
 0x19b   : > { %1814 = vmatpush2.msra.mxu0 %v1741_v51  ;;  %v1935_v8 = vld [vmem:[%s5502_s7 + $0x40] sm:$0xff] }
 0x19c   : > { %v1542_v19 = vmax.f32 %v1536_v12, 0.0  ;;  %1815 = vmatprep.subr.mxu0 %v4304_v0  ;;  %v1933_v12 = vld [vmem:[%s5502_s7 + $0x30] sm:$0xff] }
 0x19d   : > { %1816 = vmatpush2.msra.mxu0 %v1740_v53  ;;  %v3474_v53 = vld [vmem:[%s5502_s7 + $0x118] sm:$0xff] }
 0x19e   : > { %3435 = vmatprep.subr.msk.mxu1 %vm940_vm3, %v1542_v19  ;;  %3635 = vmatprep.subr.mxu0 %v4304_v0 }
 0x19f   : > { %3436 = vmatpush1.msk.msra.mxu1 %vm940_vm3, %v1541_v22 }
 0x1a0   : > { %1586 = vmatprep.subr.mxu1 %v1540_v16 }
 0x1a1   : > { %1587 = vmatpush1.msra.mxu1 %v1539_v23 }
 0x1a2   : > { %1588 = vmatprep.subr.mxu1 %v1538_v14 }
 0x1a3   : > { %1589 = vmatpush1.msra.mxu1 %v1537_v24 }
 0x1a4   : > { %3437 = vmatmul.mubr.msk.f32.vlgmr.msra.gmra.mxu1 %vm1545_vm7, %v1543_v25  ;;  %3439 = vmatprep.subr.msk.mxu1 %vm940_vm3, %v1542_v19  ;;  %v3452_v19 = vld [vmem:[%s5502_s7 + $0x80] sm:$0xff]  ;;  %v1928_v25 = vld [vmem:[%s5502_s7 + $0x8] sm:$0xff] }
 0x1a5   : > { %3440 = vmatpush1.msk.msra.mxu1 %vm940_vm3, %v1541_v22  ;;  %1628 = vmatprep.mubr.f32.mxu1 %v4304_v0  ;;  %v3451_v22 = vld [vmem:[%s5502_s7 + $0x78] sm:$0xff] }
 0x1a6   : > { %1671 = vmatprep.subr.mxu1 %v1540_v16  ;;  %v1930_v16 = vld [vmem:[%s5502_s7 + $0x18] sm:$0xff] }
 0x1a7   : > { %1672 = vmatpush1.msra.mxu1 %v1539_v23  ;;  %v3450_v23 = vld [vmem:[%s5502_s7 + $0x70] sm:$0xff] }
 0x1a8   : > { %3438 = vmatmul.mubr.msk.f32.gmra.mxu1 %vm1545_vm7, %v1544_v26  ;;  %1673 = vmatprep.subr.mxu1 %v1538_v14  ;;  %v1929_v14 = vld [vmem:[%s5502_s7 + $0x10] sm:$0xff]  ;;  %v3448_v26 = vld [vmem:[%s5502_s7 + $0x60] sm:$0xff] }
 0x1a9   : > { %1674 = vmatpush1.msra.mxu1 %v1537_v24  ;;  %1707 = vmatprep.mubr.f32.mxu1 %v4304_v0  ;;  %v3449_v24 = vld [vmem:[%s5502_s7 + $0x68] sm:$0xff] }
 0x1aa   : > { %1850 = vmatprep.subr.mxu1 %v4304_v0 }
 0x1ac   : > { %3441 = vmatmul.mubr.msk.f32.vlgmr.msra.gmra.mxu1 %vm1545_vm7, %v1635_v27  ;;  %v1927_v27 = vld [vmem:[%s5502_s7] sm:$0xff] }
 0x1ad   : > { %1713 = vmatprep.mubr.f32.mxu1 %v4304_v0  ;;  %1851 = vmatpush1.msra.mxu1 %v1843_v28  ;;  %v3447_v28 = vld [vmem:[%s5502_s7 + $0x58] sm:$0xff] }
 0x1ae   : > { %1852 = vmatprep.subr.mxu1 %v4304_v0 }
 0x1af   : > { %1853 = vmatpush1.msra.mxu1 %v1842_v29 }
 0x1b0   : > { %3442 = vmatmul.mubr.msk.f32.gmra.mxu1 %vm1545_vm7, %v1636_v30  ;;  %1854 = vmatprep.subr.mxu1 %v4304_v0 }
 0x1b1   : > { %1855 = vmatpush1.msra.mxu1 %v1841_v31 }
 0x1b2   : > { %1856 = vmatprep.subr.mxu1 %v4304_v0 }
 0x1b3   : > { %1857 = vmatpush1.msra.mxu1 %v1840_v17  ;;  %v3482_v17 = vld [vmem:[%s5502_s7 + $0x158] sm:$0xff] }
 0x1b4   : > { %1858 = vmatprep.subr.mxu1 %v4304_v0 }
 0x1b5   : > { %1859 = vmatpush1.msra.mxu1 %v1839_v18 }
 0x1b6   : > { %1860 = vmatprep.subr.mxu1 %v4304_v0 }
 0x1b7   : > { %1861 = vmatpush1.msra.mxu1 %v1838_v32 }
 0x1b8   : > { %1862 = vmatprep.subr.mxu1 %v4304_v0 }
 0x1b9   : > { %1863 = vmatpush1.msra.mxu1 %v1837_v33 }
 0x1ba   : > { %1864 = vmatprep.subr.mxu1 %v4304_v0 }
 0x1bb   : > { %1865 = vmatpush1.msra.mxu1 %v1836_v34  ;;  %v3470_v34 = vld [vmem:[%s5502_s7 + $0x100] sm:$0xff] }
 0x1bc   : > { %1866 = vmatprep.subr.mxu1 %v4304_v0 }
 0x1bd   : > { %1867 = vmatpush1.msra.mxu1 %v1835_v35  ;;  %v3481_v35 = vld [vmem:[%s5502_s7 + $0x150] sm:$0xff] }
 0x1be   : > { %1868 = vmatprep.subr.mxu1 %v4304_v0 }
 0x1bf   : > { %1869 = vmatpush1.msra.mxu1 %v1834_v21 }
 0x1c0   : > { %1870 = vmatprep.subr.mxu1 %v4304_v0 }
 0x1c1   : > { %1871 = vmatpush1.msra.mxu1 %v1833_v36 }
 0x1c2   : > { %1872 = vmatprep.subr.mxu1 %v4304_v0 }
 0x1c3   : > { %1873 = vmatpush1.msra.mxu1 %v1832_v37  ;;  %v3469_v37 = vld [vmem:[%s5502_s7 + $0xf8] sm:$0xff] }
 0x1c4   : > { %1874 = vmatprep.subr.mxu1 %v4304_v0 }
 0x1c5   : > { %1875 = vmatpush1.msra.mxu1 %v1831_v38  ;;  %v3480_v38 = vld [vmem:[%s5502_s7 + $0x148] sm:$0xff] }
 0x1c6   : > { %1876 = vmatprep.subr.mxu1 %v4304_v0 }
 0x1c7   : > { %1877 = vmatpush1.msra.mxu1 %v1830_v39 }
 0x1c8   : > { %1878 = vmatprep.subr.mxu1 %v4304_v0 }
 0x1c9   : > { %1879 = vmatpush1.msra.mxu1 %v1829_v40 }
 0x1ca   : > { %1880 = vmatprep.subr.mxu1 %v4304_v0 }
 0x1cb   : > { %1881 = vmatpush1.msra.mxu1 %v1828_v42  ;;  %v3479_v42 = vld [vmem:[%s5502_s7 + $0x140] sm:$0xff] }
 0x1cc   : > { %1902 = vmatprep.subr.mxu1 %v4304_v0 }
 0x1cd   : > { %1903 = vmatpush2.msra.mxu1 %v1849_v44  ;;  %v3478_v44 = vld [vmem:[%s5502_s7 + $0x138] sm:$0xff] }
 0x1ce   : > { %1904 = vmatprep.subr.mxu1 %v4304_v0 }
 0x1cf   : > { %1905 = vmatpush2.msra.mxu1 %v1848_v46  ;;  %v3477_v46 = vld [vmem:[%s5502_s7 + $0x130] sm:$0xff] }
 0x1d0   : > { %1906 = vmatprep.subr.mxu1 %v4304_v0 }
 0x1d1   : > { %1907 = vmatpush2.msra.mxu1 %v1847_v48  ;;  %v3476_v48 = vld [vmem:[%s5502_s7 + $0x128] sm:$0xff] }
 0x1d2   : > { %1908 = vmatprep.subr.mxu1 %v4304_v0 }
 0x1d3   : > { %1909 = vmatpush2.msra.mxu1 %v1846_v50  ;;  %v3475_v50 = vld [vmem:[%s5502_s7 + $0x120] sm:$0xff] }
 0x1d4   : > { %1910 = vmatprep.subr.mxu1 %v4304_v0 }
 0x1d5   : > { %1911 = vmatpush2.msra.mxu1 %v1845_v52  ;;  %v3463_v52 = vld [vmem:[%s5502_s7 + $0xc8] sm:$0xff] }
 0x1d6   : > { %1912 = vmatprep.subr.mxu1 %v4304_v0 }
 0x1d7   : > { %1913 = vmatpush2.msra.mxu1 %v1844_v54  ;;  %v3462_v54 = vld [vmem:[%s5502_s7 + $0xc0] sm:$0xff] }
 0x1d8   : > { %3660 = vmatprep.subr.mxu1 %v4304_v0 }
 0x264   : > { %v1624_v55 = vpop.f32.mrf.mxu1 }
 0x266   : > { %v1626_v56 = vpop.f32.mrf.mxu1 }
 0x268   : > { %v1630_v57 = vpop.f32.mrf.mxu1 }
 0x26a   : > { %v1632_v58 = vpop.f32.mrf.mxu1 }
 0x26c   : > { %v1709_v59 = vpop.f32.mrf.mxu1 }
 0x26d   : > { %v1720_v62 = vmax.f32 %v1624_v55, %v1709_v59  ;;  %v3473_v55 = vld [vmem:[%s5502_s7 + $0x110] sm:$0xff] }
 0x26e   : > { %v1711_v60 = vpop.f32.mrf.mxu1 }
 0x26f   : > { %v1721_v61 = vmax.f32 %v1626_v56, %v1711_v60 }
 0x270   : > { %v1715_v63 = vpop.f32.mrf.mxu1 }
 0x271   : > { %3443 = vmatprep.mubr.msk.f32.mxu0 %vm1746_vm8, %v1721_v61  ;;  %3445 = vmatprep.mubr.msk.f32.mxu1 %vm1746_vm8, %v1721_v61  ;;  %v1722_v5 = vmax.f32 %v1630_v57, %v1715_v63  ;;  %v3461_v57 = vld [vmem:[%s5502_s7 + $0xb8] sm:$0xff]  ;;  %v3460_v61 = vld [vmem:[%s5502_s7 + $0xb0] sm:$0xff] }
 0x272   : > { %v1717_v3 = vpop.f32.mrf.mxu1  ;;  %1818 = vmatmul.mubr.f32.vlgmr.msra.gmra.mxu0 %v1720_v62  ;;  %1915 = vmatmul.mubr.f32.vlgmr.msra.gmra.mxu1 %v1720_v62 }
 0x273   : > { %v1723_v4 = vmax.f32 %v1632_v58, %v1717_v3  ;;  %3661 = vmatpush3.msra.mxu1 %v1937_v1  ;;  %3636 = vmatpush3.msra.mxu0 %v3457_v2  ;;  %v3472_v58 = vld [vmem:[%s5502_s7 + $0x108] sm:$0xff]  ;;  %v3494_v1 = vld [vmem:[%s5502_s7 + $0x1b0] sm:$0xff] }
 0x274   : > { %3662 = vmatprep.subr.mxu1 %v4304_v0  ;;  %3637 = vmatprep.subr.mxu0 %v4304_v0  ;;  %v3493_v3 = vld [vmem:[%s5502_s7 + $0x1a8] sm:$0xff] }
 0x275   : > { %3444 = vmatprep.mubr.msk.f32.mxu0 %vm1746_vm8, %v1723_v4  ;;  %3446 = vmatprep.mubr.msk.f32.mxu1 %vm1746_vm8, %v1723_v4  ;;  %v3492_v4 = vld [vmem:[%s5502_s7 + $0x1a0] sm:$0xff] }
 0x276   : > { %1823 = vmatmul.mubr.f32.gmra.mxu0 %v1722_v5  ;;  %1920 = vmatmul.mubr.f32.gmra.mxu1 %v1722_v5  ;;  %v3491_v5 = vld [vmem:[%s5502_s7 + $0x198] sm:$0xff] }
 0x277   : > { %3663 = vmatpush3.msra.mxu1 %v1936_v6  ;;  %3638 = vmatpush3.msra.mxu0 %v3456_v7  ;;  %v3490_v6 = vld [vmem:[%s5502_s7 + $0x190] sm:$0xff]  ;;  %v3489_v7 = vld [vmem:[%s5502_s7 + $0x188] sm:$0xff] }
 0x278   : > { %3664 = vmatprep.subr.mxu1 %v4304_v0  ;;  %3639 = vmatprep.subr.mxu0 %v4304_v0 }
 0x279   : > { %3665 = vmatpush3.msra.mxu1 %v1935_v8  ;;  %3640 = vmatpush3.msra.mxu0 %v3455_v9  ;;  %v3488_v8 = vld [vmem:[%s5502_s7 + $0x180] sm:$0xff]  ;;  %v3487_v9 = vld [vmem:[%s5502_s7 + $0x178] sm:$0xff] }
 0x27a   : > { %3666 = vmatprep.subr.mxu1 %v4304_v0  ;;  %3641 = vmatprep.subr.mxu0 %v4304_v0 }
 0x27b   : > { %3667 = vmatpush3.msra.mxu1 %v1934_v10  ;;  %3642 = vmatpush3.msra.mxu0 %v3454_v11  ;;  %v3486_v10 = vld [vmem:[%s5502_s7 + $0x170] sm:$0xff]  ;;  %v3485_v11 = vld [vmem:[%s5502_s7 + $0x168] sm:$0xff] }
 0x27c   : > { %3668 = vmatprep.subr.mxu1 %v4304_v0  ;;  %3643 = vmatprep.subr.mxu0 %v4304_v0 }
 0x27d   : > { %3669 = vmatpush3.msra.mxu1 %v1933_v12  ;;  %3644 = vmatpush3.msra.mxu0 %v3453_v13  ;;  %v3484_v13 = vld [vmem:[%s5502_s7 + $0x160] sm:$0xff] }
 0x27e   : > { %3670 = vmatprep.subr.mxu1 %v4304_v0  ;;  %3645 = vmatprep.subr.mxu0 %v4304_v0 }
 0x27f   : > { %3671 = vmatpush3.msra.mxu1 %v1932_v15  ;;  %3646 = vmatpush3.msra.mxu0 %v3452_v19 }
 0x280   : > { %3672 = vmatprep.subr.mxu1 %v4304_v0  ;;  %3647 = vmatprep.subr.mxu0 %v4304_v0 }
 0x281   : > { %3673 = vmatpush3.msra.mxu1 %v1931_v20  ;;  %3648 = vmatpush3.msra.mxu0 %v3451_v22  ;;  %v2618_v20 = vld [vmem:[%s5507_s12 + $0x40] sm:$0x3f]  ;;  %v2617_v22 = vld [vmem:[%s5507_s12 + $0x38] sm:$0xff] }
 0x282   : > { %3674 = vmatprep.subr.mxu1 %v4304_v0  ;;  %3649 = vmatprep.subr.mxu0 %v4304_v0 }
 0x283   : > { %3675 = vmatpush3.msra.mxu1 %v1930_v16  ;;  %3650 = vmatpush3.msra.mxu0 %v3450_v23  ;;  %v2616_v16 = vld [vmem:[%s5507_s12 + $0x30] sm:$0xff]  ;;  %v2615_v23 = vld [vmem:[%s5507_s12 + $0x28] sm:$0xff] }
 0x284   : > { %3676 = vmatprep.subr.mxu1 %v4304_v0  ;;  %3651 = vmatprep.subr.mxu0 %v4304_v0 }
 0x285   : > { %3677 = vmatpush3.msra.mxu1 %v1929_v14  ;;  %3652 = vmatpush3.msra.mxu0 %v3449_v24  ;;  %v2614_v14 = vld [vmem:[%s5507_s12 + $0x20] sm:$0xff] }
 0x286   : > { %3678 = vmatprep.subr.mxu1 %v4304_v0  ;;  %3653 = vmatprep.subr.mxu0 %v4304_v0 }
 0x287   : > { %3679 = vmatpush3.msra.mxu1 %v1928_v25  ;;  %3654 = vmatpush3.msra.mxu0 %v3448_v26 }
 0x288   : > { %3680 = vmatprep.subr.mxu1 %v4304_v0  ;;  %3655 = vmatprep.subr.mxu0 %v4304_v0 }
 0x289   : > { %3681 = vmatpush3.msra.mxu1 %v1927_v27  ;;  %3682 = vmatprep.mubr.msk.f32.mxu1 %vm4305_vm9, %v4304_v0 }
 0x28a   : > { %3710 = vmatprep.subr.mxu1 %v4304_v0  ;;  %3656 = vmatpush3.msra.mxu0 %v3447_v28 }
 0x28b   : > { %3657 = vmatprep.mubr.msk.f32.mxu0 %vm4305_vm9, %v4304_v0  ;;  %3685 = vmatprep.subr.mxu0 %v4304_v0 }
 0x332   : > { %v1819_v29 = vpop.f32.mrf.mxu0  ;;  %v1916_v30 = vpop.f32.mrf.mxu1 }
 0x333   : > { %v5137_v31 = vmax.f32 %v1819_v29, %v1916_v30 }
 0x334   : > { %v1821_v18 = vpop.f32.mrf.mxu0  ;;  %v1918_v32 = vpop.f32.mrf.mxu1 }
 0x335   : > { %v1951_v33 = vrot.slane %v5137_v31, 1  ;;  %3683 = vmatmul.mubr.msk.f32.vlgmr.msra.gmra.mxu1 %vm1952_vm10, %v5137_v31  ;;  %v2198_v60 = vrot.slane %v5137_v31, 3  ;;  %v2110_v63 = vrot.slane %v5137_v31, 2  ;;  %v2286_v15 = vrot.slane %v5137_v31, 4 }
 0x336   : > { %3711 = vmatpush3.msra.mxu1 %v3482_v17  ;;  %v1824_v21 = vpop.f32.mrf.mxu0  ;;  %v1921_v36 = vpop.f32.mrf.mxu1  ;;  %3732 = vmatprep.mubr.msk.f32.mxu1 %vm4305_vm9, %v4304_v0 }
 0x337   : > { %3712 = vmatprep.subr.mxu1 %v4304_v0  ;;  %3658 = vmatmul.mubr.msk.f32.vlgmr.msra.gmra.mxu0 %vm1952_vm10, %v1951_v33  ;;  %v5201_v51 = vmax.f32 %v1824_v21, %v1921_v36 }
 0x338   : > { %3686 = vmatpush3.msra.mxu0 %v3470_v34  ;;  %3713 = vmatpush3.msra.mxu1 %v3481_v35  ;;  %v1826_v39 = vpop.f32.mrf.mxu0  ;;  %v1923_v40 = vpop.f32.mrf.mxu1  ;;  %v3496_v34 = vld [vmem:[#allocation7] ss:$0 sm:$0xff] }
 0x339   : > { %3687 = vmatprep.subr.mxu0 %v4304_v0  ;;  %3714 = vmatprep.subr.mxu1 %v4304_v0  ;;  %v2199_v56 = vrot.slane %v5201_v51, 3  ;;  %v2111_v59 = vrot.slane %v5201_v51, 2  ;;  %v2287_v12 = vrot.slane %v5201_v51, 4  ;;  %v2449_v39 = vld [vmem:[#allocation10] sm:$0x7] }
 0x33a   : > { %3688 = vmatpush3.msra.mxu0 %v3469_v37  ;;  %3715 = vmatpush3.msra.mxu1 %v3480_v38  ;;  %v2371_v38 = vld [vmem:[#allocation8] sm:$0x7] }
 0x33b   : > { %3689 = vmatprep.subr.mxu0 %v4304_v0  ;;  %3716 = vmatprep.subr.mxu1 %v4304_v0  ;;  %v2200_v62 = vsel %vm1057_vm4, %v2198_v60, %v2199_v56  ;;  %v2112_v2 = vsel %vm940_vm3, %v2110_v63, %v2111_v59  ;;  %v2288_v19 = vsel %vm746_vm0, %v2286_v15, %v2287_v12  ;;  %v2532_v40 = vld [vmem:[%s5506_s11 + $0x40] sm:$0x3f]  ;;  %v2772_v60 = vld [vmem:[#allocation13 + $0x8] sm:$0xff]  ;;  %v2852_v15 = vld [vmem:[#allocation14] sm:$0xff]  ;;  %vm3181_vm0 = vcmask 90112  }
 0x33c   : > { %3690 = vmatpush3.msra.mxu0 %v3468_v41  ;;  %3717 = vmatpush3.msra.mxu1 %v3479_v42  ;;  %v2531_v41 = vld [vmem:[%s5506_s11 + $0x38] sm:$0xff]  ;;  %v2530_v42 = vld [vmem:[%s5506_s11 + $0x30] sm:$0xff]  ;;  %v2524_v51 = vld [vmem:[%s5506_s11] sm:$0xff] }
 0x33d   : > { %3691 = vmatprep.subr.mxu0 %v4304_v0  ;;  %3718 = vmatprep.subr.mxu1 %v4304_v0  ;;  %v2773_v59 = vld [vmem:[#allocation13 + $0x10] sm:$0xff]  ;;  %v2853_v12 = vld [vmem:[#allocation14 + $0x8] sm:$0xff] }
 0x33e   : > { %3692 = vmatpush3.msra.mxu0 %v3467_v43  ;;  %3719 = vmatpush3.msra.mxu1 %v3478_v44  ;;  %v2529_v43 = vld [vmem:[%s5506_s11 + $0x28] sm:$0xff]  ;;  %v2528_v44 = vld [vmem:[%s5506_s11 + $0x20] sm:$0xff] }
 0x33f   : > { %3693 = vmatprep.subr.mxu0 %v4304_v0  ;;  %3720 = vmatprep.subr.mxu1 %v4304_v0 }
 0x340   : > { %3694 = vmatpush3.msra.mxu0 %v3466_v45  ;;  %3721 = vmatpush3.msra.mxu1 %v3477_v46  ;;  %v2527_v45 = vld [vmem:[%s5506_s11 + $0x18] sm:$0xff] }
 0x341   : > { %3695 = vmatprep.subr.mxu0 %v4304_v0  ;;  %3722 = vmatprep.subr.mxu1 %v4304_v0  ;;  %v2613_v46 = vld [vmem:[%s5507_s12 + $0x18] sm:$0xff] }
 0x342   : > { %3696 = vmatpush3.msra.mxu0 %v3465_v47  ;;  %3723 = vmatpush3.msra.mxu1 %v3476_v48  ;;  %v2526_v47 = vld [vmem:[%s5506_s11 + $0x10] sm:$0xff] }
 0x343   : > { %3697 = vmatprep.subr.mxu0 %v4304_v0  ;;  %3724 = vmatprep.subr.mxu1 %v4304_v0  ;;  %v2612_v48 = vld [vmem:[%s5507_s12 + $0x10] sm:$0xff] }
 0x344   : > { %3698 = vmatpush3.msra.mxu0 %v3464_v49  ;;  %3725 = vmatpush3.msra.mxu1 %v3475_v50  ;;  %v2525_v49 = vld [vmem:[%s5506_s11 + $0x8] sm:$0xff] }
 0x345   : > { %3699 = vmatprep.subr.mxu0 %v4304_v0  ;;  %3726 = vmatprep.subr.mxu1 %v4304_v0  ;;  %v2611_v50 = vld [vmem:[%s5507_s12 + $0x8] sm:$0xff] }
 0x346   : > { %3700 = vmatpush3.msra.mxu0 %v3463_v52  ;;  %3727 = vmatpush3.msra.mxu1 %v3474_v53  ;;  %v2610_v52 = vld [vmem:[%s5507_s12] sm:$0xff] }
 0x347   : > { %3701 = vmatprep.subr.mxu0 %v4304_v0  ;;  %3728 = vmatprep.subr.mxu1 %v4304_v0 }
 0x348   : > { %3702 = vmatpush3.msra.mxu0 %v3462_v54  ;;  %3729 = vmatpush3.msra.mxu1 %v3473_v55 }
 0x349   : > { %3703 = vmatprep.subr.mxu0 %v4304_v0  ;;  %3730 = vmatprep.subr.mxu1 %v4304_v0 }
 0x34a   : > { %3704 = vmatpush3.msra.mxu0 %v3461_v57  ;;  %3731 = vmatpush3.msra.mxu1 %v3472_v58  ;;  %v2774_v58 = vld [vmem:[#allocation13 + $0x18] sm:$0x3f] }
 0x34b   : > { %3705 = vmatprep.subr.mxu0 %v4304_v0  ;;  %3733 = vmatmul.mubr.msk.f32.vlgmr.msra.gmra.mxu1 %vm1952_vm10, %v2200_v62 }
 0x34c   : > { %3706 = vmatpush3.msra.mxu0 %v3460_v61  ;;  %3707 = vmatprep.mubr.msk.f32.mxu0 %vm4305_vm9, %v4304_v0 }
 0x34d   : > { %3708 = vmatmul.mubr.msk.f32.vlgmr.msra.gmra.mxu0 %vm1952_vm10, %v2112_v2  ;;  %3735 = vmatprep.subr.mxu0 %v4304_v0 }
 0x34e   : > { %3736 = vmatpush3.msra.mxu0 %v3494_v1  ;;  %3757 = vmatprep.mubr.msk.f32.mxu0 %vm4305_vm9, %v4304_v0  ;;  %v2693_v1 = vld [vmem:[#allocation11] sm:$0x7] }
 0x34f   : > { %3737 = vmatprep.subr.mxu0 %v4304_v0  ;;  %3760 = vmatprep.subr.mxu1 %v4304_v0 }
 0x350   : > { %3738 = vmatpush3.msra.mxu0 %v3493_v3  ;;  %3762 = vmatprep.mubr.msk.f32.mxu1 %vm4305_vm9, %v4304_v0 }
 0x351   : > { %3739 = vmatprep.subr.mxu0 %v4304_v0 }
 0x352   : > { %3740 = vmatpush3.msra.mxu0 %v3492_v4  ;;  %v2771_v4 = vld [vmem:[#allocation13] sm:$0xff] }
 0x353   : > { %3741 = vmatprep.subr.mxu0 %v4304_v0 }
 0x354   : > { %3742 = vmatpush3.msra.mxu0 %v3491_v5  ;;  %v2855_v5 = vld [vmem:[#allocation14 + $0x18] sm:$0x3f] }
 0x355   : > { %3743 = vmatprep.subr.mxu0 %v4304_v0 }
 0x356   : > { %3744 = vmatpush3.msra.mxu0 %v3490_v6  ;;  %v2860_v6 = vld [vmem:[#allocation14 + $0x38] sm:$0x3f] }
 0x357   : > { %3745 = vmatprep.subr.mxu0 %v4304_v0 }
 0x358   : > { %3746 = vmatpush3.msra.mxu0 %v3489_v7 }
 0x359   : > { %3747 = vmatprep.subr.mxu0 %v4304_v0 }
 0x35a   : > { %3748 = vmatpush3.msra.mxu0 %v3488_v8  ;;  %v2859_v8 = vld [vmem:[#allocation14 + $0x30] sm:$0xff] }
 0x35b   : > { %3749 = vmatprep.subr.mxu0 %v4304_v0 }
 0x35c   : > { %3750 = vmatpush3.msra.mxu0 %v3487_v9 }
 0x35d   : > { %3751 = vmatprep.subr.mxu0 %v4304_v0 }
 0x35e   : > { %3752 = vmatpush3.msra.mxu0 %v3486_v10  ;;  %v2858_v10 = vld [vmem:[#allocation14 + $0x28] sm:$0xff] }
 0x35f   : > { %3753 = vmatprep.subr.mxu0 %v4304_v0 }
 0x360   : > { %3754 = vmatpush3.msra.mxu0 %v3485_v11  ;;  %v2854_v11 = vld [vmem:[#allocation14 + $0x10] sm:$0xff] }
 0x361   : > { %3755 = vmatprep.subr.mxu0 %v4304_v0 }
 0x362   : > { %3756 = vmatpush3.msra.mxu0 %v3484_v13  ;;  %v2857_v13 = vld [vmem:[#allocation14 + $0x20] sm:$0xff] }
 0x363   : > { %3758 = vmatmul.mubr.msk.f32.vlgmr.msra.gmra.mxu0 %vm1952_vm10, %v2288_v19  ;;  %3791 = vmatprep.subr.mxu0 %v4304_v0  ;;  %v3105_v19 = vld [vmem:[%s5512_s17 + $0x38] sm:$0xff] }
 0x364   : > { %3809 = vmatprep.mubr.msk.f32.mxu0 %vm4305_vm9, %v4304_v0  ;;  %3792 = vmatpush3.msk.msra.mxu0 %vm940_vm3, %v2618_v20 }
 0x365   : > { %3793 = vmatprep.subr.mxu0 %v4304_v0 }
 0x366   : > { %3794 = vmatpush3.msra.mxu0 %v2617_v22 }
 0x367   : > { %3795 = vmatprep.subr.mxu0 %v4304_v0 }
 0x368   : > { %3796 = vmatpush3.msra.mxu0 %v2616_v16  ;;  %v3017_v16 = vld [vmem:[#allocation14 + $0x58] sm:$0x3f] }
 0x369   : > { %3797 = vmatprep.subr.mxu0 %v4304_v0 }
 0x36a   : > { %3798 = vmatpush3.msra.mxu0 %v2615_v23 }
 0x36b   : > { %3799 = vmatprep.subr.mxu0 %v4304_v0 }
 0x36c   : > { %3800 = vmatpush3.msra.mxu0 %v2614_v14  ;;  %v3104_v14 = vld [vmem:[%s5512_s17 + $0x30] sm:$0xff] }
 0x36d   : > { %3801 = vmatprep.subr.mxu0 %v4304_v0 }
 0x36e   : > { %3802 = vmatpush3.msra.mxu0 %v2613_v46 }
 0x36f   : > { %3803 = vmatprep.subr.mxu0 %v4304_v0 }
 0x370   : > { %3804 = vmatpush3.msra.mxu0 %v2612_v48 }
 0x371   : > { %3805 = vmatprep.subr.mxu0 %v4304_v0 }
 0x372   : > { %3806 = vmatpush3.msra.mxu0 %v2611_v50 }
 0x373   : > { %3807 = vmatprep.subr.mxu0 %v4304_v0 }
 0x374   : > { %3808 = vmatpush3.msra.mxu0 %v2610_v52 }
 0x375   : > { %3817 = vmatprep.subr.mxu0 %v4304_v0 }
 0x3f5   : > { %v2093_v24 = vpop.f32.mrf.mxu1 }
 0x3f7   : > { %v2021_v25 = vpop.f32.mrf.mxu0  ;;  %v3684_v26 = vpop.f32.mrf.mxu1 }
 0x3f8   : > { %v2094_v17 = vadd.f32 %v2093_v24, %v2021_v25  ;;  %v3016_v24 = vld [vmem:[#allocation14 + $0x50] sm:$0xff]  ;;  %v3015_v25 = vld [vmem:[#allocation14 + $0x48] sm:$0xff]  ;;  %v3014_v26 = vld [vmem:[#allocation14 + $0x40] sm:$0xff] }
 0x3f9   : > { %v3659_v27 = vpop.f32.mrf.mxu0 }
 0x40b   : > { %v2269_v28 = vpop.f32.mrf.mxu1 }
 0x40d   : > { %v2181_v29 = vpop.f32.mrf.mxu0  ;;  %v3734_v30 = vpop.f32.mrf.mxu1 }
 0x40e   : > { %v2185_v18 = vadd.f32 %v2181_v29, %v2094_v17  ;;  %v3102_v29 = vld [vmem:[%s5512_s17 + $0x20] sm:$0xff]  ;;  %v3101_v30 = vld [vmem:[%s5512_s17 + $0x18] sm:$0xff]  ;;  %v3099_v17 = vld [vmem:[%s5512_s17 + $0x8] sm:$0xff] }
 0x40f   : > { %v3709_v31 = vpop.f32.mrf.mxu0 }
 0x410   : > { %v2273_v32 = vadd.f32 %v2269_v28, %v2185_v18  ;;  %v3103_v28 = vld [vmem:[%s5512_s17 + $0x28] sm:$0xff]  ;;  %v3100_v31 = vld [vmem:[%s5512_s17 + $0x10] sm:$0xff]  ;;  %v3098_v18 = vld [vmem:[%s5512_s17] sm:$0xff] }
 0x423   : > { %v2357_v33 = vpop.f32.mrf.mxu0 }
 0x424   : > { %v2361_v35 = vadd.f32 %v2357_v33, %v2273_v32 }
 0x425   : > { %v3759_v21 = vpop.f32.mrf.mxu0 }
 0x426   : > { %v2369_v36 = vadd.f32 %v3496_v34, %v2361_v35 }
 0x428   : > { %v2370_v37 = vmax.f32 %v2369_v36, 0.0 }
 0x42a   : > { %3761 = vmatpush3.msk.msra.mxu1 %vm733_vm1, %v2370_v37 }
 0x42b   : > { %3763 = vmatmul.mubr.msk.f32.vlgmr.msra.gmra.mxu1 %vm2372_vm11, %v2371_v38  ;;  %3765 = vmatprep.subr.mxu1 %v4304_v0 }
 0x42c   : > { %3766 = vmatpush3.msk.msra.mxu1 %vm733_vm1, %v2370_v37  ;;  %3767 = vmatprep.mubr.msk.f32.mxu1 %vm4305_vm9, %v4304_v0  ;;  %v3095_v37 = vld [vmem:[%s5511_s16] sm:$0x1] }
 0x42d   : > { %3770 = vmatprep.subr.mxu1 %v4304_v0 }
 0x42f   : > { %3768 = vmatmul.mubr.msk.f32.vlgmr.msra.gmra.mxu1 %vm2372_vm11, %v2449_v39 }
 0x430   : > { %3771 = vmatpush3.msk.msra.mxu1 %vm940_vm3, %v2532_v40  ;;  %3788 = vmatprep.mubr.msk.f32.mxu1 %vm4305_vm9, %v4304_v0 }
 0x431   : > { %3772 = vmatprep.subr.mxu1 %v4304_v0 }
 0x432   : > { %3773 = vmatpush3.msra.mxu1 %v2531_v41  ;;  %v3106_v41 = vld [vmem:[%s5513_s18] sm:$0x1] }
 0x433   : > { %3774 = vmatprep.subr.mxu1 %v4304_v0 }
 0x434   : > { %3775 = vmatpush3.msra.mxu1 %v2530_v42 }
 0x435   : > { %3776 = vmatprep.subr.mxu1 %v4304_v0 }
 0x436   : > { %3777 = vmatpush3.msra.mxu1 %v2529_v43 }
 0x437   : > { %3778 = vmatprep.subr.mxu1 %v4304_v0 }
 0x438   : > { %3779 = vmatpush3.msra.mxu1 %v2528_v44 }
 0x439   : > { %3780 = vmatprep.subr.mxu1 %v4304_v0 }
 0x43a   : > { %3781 = vmatpush3.msra.mxu1 %v2527_v45 }
 0x43b   : > { %3782 = vmatprep.subr.mxu1 %v4304_v0 }
 0x43c   : > { %3783 = vmatpush3.msra.mxu1 %v2526_v47 }
 0x43d   : > { %3784 = vmatprep.subr.mxu1 %v4304_v0 }
 0x43e   : > { %3785 = vmatpush3.msra.mxu1 %v2525_v49 }
 0x43f   : > { %3786 = vmatprep.subr.mxu1 %v4304_v0 }
 0x440   : > { %3787 = vmatpush3.msra.mxu1 %v2524_v51 }
 0x441   : > { %3812 = vmatprep.subr.mxu1 %v4304_v0 }
 0x4eb   : > { %v2445_v53 = vpop.f32.mrf.mxu1 }
 0x4ed   : > { %v3764_v54 = vpop.f32.mrf.mxu1 }
 0x4ef   : > { %v2519_v55 = vpop.f32.mrf.mxu1 }
 0x4f0   : > { %v2523_v56 = vmax.f32 %v2445_v53, %v2519_v55 }
 0x4f1   : > { %v3769_v57 = vpop.f32.mrf.mxu1 }
 0x4f2   : > { %3789 = vmatmul.mubr.msk.f32.vlgmr.msra.gmra.mxu1 %vm2533_vm12, %v2523_v56  ;;  %3810 = vmatmul.mubr.msk.f32.vlgmr.msra.gmra.mxu0 %vm2533_vm12, %v2523_v56 }
 0x4f3   : > { %3814 = vmatprep.mubr.msk.f32.mxu1 %vm4305_vm9, %v4304_v0  ;;  %3825 = vmatprep.mubr.msk.f32.mxu0 %vm4305_vm9, %v4304_v0 }
 0x4f4   : > { %3818 = vmatpush3.msk.msra.mxu0 %vm940_vm3, %v2774_v58 }
 0x4f5   : > { %3819 = vmatprep.subr.mxu0 %v4304_v0 }
 0x4f6   : > { %3820 = vmatpush3.msra.mxu0 %v2773_v59 }
 0x4f7   : > { %3821 = vmatprep.subr.mxu0 %v4304_v0 }
 0x4f8   : > { %3822 = vmatpush3.msra.mxu0 %v2772_v60 }
 0x4f9   : > { %3823 = vmatprep.subr.mxu0 %v4304_v0 }
 0x4fa   : > { %3824 = vmatpush3.msra.mxu0 %v2771_v4 }
 0x4fb   : > { %3828 = vmatprep.subr.mxu0 %v4304_v0 }
 0x5b2   : > { %v2606_v61 = vpop.f32.mrf.mxu1  ;;  %v2688_v62 = vpop.f32.mrf.mxu0 }
 0x5b3   : > { %v2692_v63 = vmax.f32 %v2606_v61, %v2688_v62 }
 0x5b4   : > { %v3790_v2 = vpop.f32.mrf.mxu1  ;;  %v3811_v3 = vpop.f32.mrf.mxu0 }
 0x5b5   : > { %3813 = vmatpush3.msk.msra.mxu1 %vm1292_vm5, %v2692_v63 }
 0x5b6   : > { %3815 = vmatmul.mubr.msk.f32.vlgmr.msra.gmra.mxu1 %vm2694_vm13, %v2693_v1  ;;  %3839 = vmatprep.subr.mxu1 %v4304_v0 }
 0x5b7   : > { %3847 = vmatprep.mubr.msk.f32.mxu1 %vm4305_vm9, %v4304_v0  ;;  %3840 = vmatpush3.msk.msra.mxu1 %vm940_vm3, %v2855_v5 }
 0x5b8   : > { %3841 = vmatprep.subr.mxu1 %v4304_v0 }
 0x5b9   : > { %3842 = vmatpush3.msra.mxu1 %v2854_v11 }
 0x5ba   : > { %3843 = vmatprep.subr.mxu1 %v4304_v0 }
 0x5bb   : > { %3844 = vmatpush3.msra.mxu1 %v2853_v12 }
 0x5bc   : > { %3845 = vmatprep.subr.mxu1 %v4304_v0 }
 0x5bd   : > { %3846 = vmatpush3.msra.mxu1 %v2852_v15 }
 0x5be   : > { %3861 = vmatprep.subr.mxu1 %v4304_v0 }
 0x676   : > { %v2767_v7 = vpop.f32.mrf.mxu1 }
 0x677   : > { %3826 = vmatmul.mubr.msk.f32.vlgmr.msra.gmra.mxu0 %vm2775_vm14, %v2767_v7 }
 0x678   : > { %v3816_v9 = vpop.f32.mrf.mxu1  ;;  %3829 = vmatpush3.msk.msra.mxu0 %vm940_vm3, %v2860_v6  ;;  %3836 = vmatprep.mubr.msk.f32.mxu0 %vm4305_vm9, %v4304_v0 }
 0x679   : > { %3830 = vmatprep.subr.mxu0 %v4304_v0 }
 0x67a   : > { %3831 = vmatpush3.msra.mxu0 %v2859_v8 }
 0x67b   : > { %3832 = vmatprep.subr.mxu0 %v4304_v0 }
 0x67c   : > { %3833 = vmatpush3.msra.mxu0 %v2858_v10 }
 0x67d   : > { %3834 = vmatprep.subr.mxu0 %v4304_v0 }
 0x67e   : > { %3835 = vmatpush3.msra.mxu0 %v2857_v13 }
 0x67f   : > { %3850 = vmatprep.subr.mxu0 %v4304_v0 }
 0x737   : > { %v2848_v20 = vpop.f32.mrf.mxu0 }
 0x738   : > { %v2862_v22 = vrot.slane %v2848_v20, 1  ;;  %3848 = vmatmul.mubr.msk.f32.vlgmr.msra.gmra.mxu1 %vm2775_vm14, %v2848_v20  ;;  %v3018_v27 = vrot.slane %v2848_v20, 2 }
 0x739   : > { %v3827_v23 = vpop.f32.mrf.mxu0  ;;  %3862 = vmatpush3.msra.mxu1 %v3105_v19  ;;  %3877 = vmatprep.mubr.msk.f32.mxu1 %vm4305_vm9, %v4304_v0 }
 0x73a   : > { %3837 = vmatmul.mubr.msk.f32.vlgmr.msra.gmra.mxu0 %vm2775_vm14, %v2862_v22  ;;  %3863 = vmatprep.subr.mxu1 %v4304_v0 }
 0x73b   : > { %3851 = vmatpush3.msk.msra.mxu0 %vm940_vm3, %v3017_v16  ;;  %3858 = vmatprep.mubr.msk.f32.mxu0 %vm4305_vm9, %v4304_v0 }
 0x73c   : > { %3852 = vmatprep.subr.mxu0 %v4304_v0  ;;  %3864 = vmatpush3.msra.mxu1 %v3104_v14 }
 0x73d   : > { %3853 = vmatpush3.msra.mxu0 %v3016_v24  ;;  %3865 = vmatprep.subr.mxu1 %v4304_v0 }
 0x73e   : > { %3854 = vmatprep.subr.mxu0 %v4304_v0  ;;  %3866 = vmatpush3.msra.mxu1 %v3103_v28 }
 0x73f   : > { %3855 = vmatpush3.msra.mxu0 %v3015_v25  ;;  %3867 = vmatprep.subr.mxu1 %v4304_v0 }
 0x740   : > { %3856 = vmatprep.subr.mxu0 %v4304_v0  ;;  %3868 = vmatpush3.msra.mxu1 %v3102_v29 }
 0x741   : > { %3857 = vmatpush3.msra.mxu0 %v3014_v26  ;;  %3869 = vmatprep.subr.mxu1 %v4304_v0 }
 0x742   : > { %3859 = vmatmul.mubr.msk.f32.vlgmr.msra.gmra.mxu0 %vm2775_vm14, %v3018_v27  ;;  %3870 = vmatpush3.msra.mxu1 %v3101_v30 }
 0x743   : > { %3871 = vmatprep.subr.mxu1 %v4304_v0 }
 0x744   : > { %3872 = vmatpush3.msra.mxu1 %v3100_v31 }
 0x745   : > { %3873 = vmatprep.subr.mxu1 %v4304_v0 }
 0x746   : > { %3874 = vmatpush3.msra.mxu1 %v3099_v17 }
 0x747   : > { %3875 = vmatprep.subr.mxu1 %v4304_v0 }
 0x748   : > { %3876 = vmatpush3.msra.mxu1 %v3098_v18 }
 0x7f8   : > { %v3009_v32 = vpop.f32.mrf.mxu1 }
 0x7fa   : > { %v2934_v33 = vpop.f32.mrf.mxu0  ;;  %v3849_v34 = vpop.f32.mrf.mxu1 }
 0x7fb   : > { %v3010_v21 = vadd.f32 %v3009_v32, %v2934_v33 }
 0x7fc   : > { %v3838_v35 = vpop.f32.mrf.mxu0 }
 0x802   : > { %v3090_v36 = vpop.f32.mrf.mxu0 }
 0x803   : > { %v3094_v38 = vadd.f32 %v3090_v36, %v3010_v21 }
 0x804   : > { %v3860_v39 = vpop.f32.mrf.mxu0 }
 0x805   : > { %v3096_v0 = vadd.f32 %v3095_v37, %v3094_v38 }
 0x807   : > { %v3097_v40 = vmax.f32 %v3096_v0, 0.0 }
 0x809   : > { %3878 = vmatmul.mubr.msk.f32.vlgmr.msra.gmra.mxu1 %vm3107_vm15, %v3097_v40 }
 0x8c9   : > { %v3177_v42 = vpop.f32.mrf.mxu1 }
 0x8ca   : > { %v3178_v43 = vadd.f32 %v3177_v42, %v3106_v41 }
 0x8cb   : > { %v3879_v44 = vpop.f32.mrf.mxu1 }
 0x8cc   : > { %3182 = vst.msk [vmem:[%s703_s27] sm:$0x1] %vm3181_vm0, %v3178_v43 }
 0x8cd   : > { %4225 = shalt.err (!%p4222_p2)
}
 0x8ce   : > { %s4226_s26 = scalar_lea.hbm %s5460_s20, 16  ;;  %s4230_s27 = scalar_lea.hbm %s5565_s24, 32 }
 0x8cf   : > { %p4227_p12 = scmp.ne.s32.totalorder %s5460_s20, %s4226_s26  ;;  %p4231_p10 = scmp.lt.s32.totalorder %s5460_s20, %s5565_s24 }
 0x8d0   : > { %p4232_p4 = scmp.lt.s32.totalorder %s4230_s27, %s4226_s26 }
 0x8d1   : > { %p4228_p5 = pnand %p4227_p12, %p5566_p11 }
 0x8d2   : > { %p4233_p7 = por %p4232_p4, %p4231_p10 }
 0x8d3   : > { %p4229_p6 = pneg %p4228_p5 }
 0x8d5   : > { %p4234_p8 = pnand %p4233_p7, %p4229_p6 }
 0x8d7   : > { %4237 = shalt.err (!%p4234_p8)
}
 0x8d8   : > { %3912 = dma.vmem_to_hbm [thread:$0]  (%p5566_p11), %s3197_s28, 16, %s5460_s20, %s3184_s21  }
 0x8d9 PF: > { %s5567_s29 = sld [smem:[#allocation25_spill]] }
 0x8da   : > { %s5568_s1 = sld [smem:[#allocation23_spill]] }
 0x8db   : > { %s5569_s2 = sld [smem:[#allocation28_spill]] }
 0x8df   : > { %p3959_p0 = scmp.ge.s32.totalorder %s5567_s29, 2 }
 0x8e0   : > { %s3208_s0 = sand.u32 1, %s5568_s1  }
 0x8e1   : > { %p5570_p13 = scmp.ne.s32.totalorder %s5569_s2, 0  ;;  %s3209_s22 = scalar_lea.sflag [#allocation4], %s3208_s0 }
 0x8e3   : > { %p3940_p1 = pnand %p3959_p0, %p5570_p13 }
 0x8e5   : > { %p3941_p9 = pneg %p3940_p1 }
 0x8e7   : > { %4275 = dma.done.wait (%p3941_p9), %s3209_s22, 16  }
 0x8e8   : > { %4277 = vsyncadd (%p3941_p9), %s3209_s22, 4294967280  ;;  %s5571_s21 = sld [smem:[#allocation26_spill]]  ;;  %s5574_s0 = smov %s4284_s30 }
 0x8e9   : > { %s5572_s26 = sld [smem:[#allocation24_spill]] }
 0x8ea   : > { %s5573_s20 = sld [smem:[#allocation27_spill]] }
 0x8ee   : > { %p34_p3 = scmp.ge.s32.totalorder %s5571_s21, 4  }
 0x8ef   : > { %s5575_s30 = smov %s5572_s26 }
 0x8f0   :  { %36 = sbr.rel (!%p34_p3) target bundleno = 15 (0xf), region = 176 }
 0x8f5   :  { %3213 = vsyncpa [#allocation3], 1 }
 0x8f6   :  { %3215 = vsyncpa [#allocation3 + $0x1], 1 }
 0x8f7   :  { %3216 = vsyncpa [#allocation6], 1 }
 0x8f8   :  { %3217 = vsyncpa [#allocation9], 1 }
 0x8f9   :  { %3218 = vsyncpa [#allocation12], 1 }
 0x8fa   :  { %3219 = vsyncpa [#allocation15], 1 }
 0x8fb   :  { %3220 = vsyncpa [#allocation4], 1 }
 0x8fc   :  { %3222 = vsyncpa [#allocation4 + $0x1], 1 }

</bundles_post_ra>
